<compile_context>
chip_gen: v5e
topology: v5e:2x2
jax: 0.10.0
libtpu: 0.0.40
codegen_flags: <defaults>
</compile_context>

<pallas_src>
import jax
import jax.numpy as jnp
from jax.experimental import pallas as pl
from jax.experimental.pallas import tpu as pltpu

# ---- small, module-consistent hyperparameters ----
B    = 2     # real batch
BP   = 8     # batch padded to the 8-sublane granule
T    = 8     # q_max (question length)
DW   = 32    # dim_word
H    = 32    # dim_hidden (== mid_size, required by Classifier's lin12(q_out))
H3   = 3 * H
M    = 32    # mid_size
NOBJ = 8     # number of objects
DV   = 32    # dim_vision (after stripping the 4 box coords)
G    = 2     # glimpses
NCLS = 16    # num answer classes
NTOK = 50    # question vocab size
NTOK_PAD = 64

F32  = jnp.float32
VMEM = pl.BlockSpec(memory_space=pltpu.MemorySpace.VMEM)

# ---- packed weight-slab row offsets (all 8-sublane aligned) ----
R_EW  = 0                    # (NTOK_PAD, 3H)  emb_pad @ W_ih(fused) + b_gi
R_WHH = R_EW + NTOK_PAD      # (H, 3H)         fused recurrent weights (r|z|n)
R_BHN = R_WHH + H            # (1, H)          bhh_n (inside the r*(...) term)
R_WV  = R_BHN + 8            # (DV, M)         attention v projection
R_BV  = R_WV + DV            # (1, M)
R_WQX = R_BV + 8             # (H, M+H)        [att_wq | cls_w12] lane-fused
R_BQX = R_WQX + H            # (1, M+H)        [att_bq | cls_b12]
R_WL  = R_BQX + 8            # (M, G)          attention logits
R_BL  = R_WL + M             # (1, G)
R_W11 = R_BL + 8             # (G*DV, H)       classifier lin11
R_B11 = R_W11 + G * DV       # (1, H)
R_W2  = R_B11 + 8            # (H, H)          classifier lin2 (relu FCNet)
R_B2  = R_W2 + H             # (1, H)
R_W3  = R_B2 + 8             # (H, NCLS)       classifier lin3
R_B3  = R_W3 + H             # (1, NCLS)
R_TOTAL = R_B3 + 8           # 376 rows x 128 lanes


# ---------------------------------------------------------------------------
# Single fused kernel: embedding -> GRU encoder -> UpDn attention -> Classifier
# ---------------------------------------------------------------------------
def net_kernel(ints_ref, vis_ref, w_ref, ans_ref, att_ref):
    f32 = jnp.float32

    # ---------------- embedding + hoisted GRU input projection ----------------
    # One (T*BP, NTOK_PAD) @ (NTOK_PAD, 3H) matmul: the one-hot picks the row of
    # EW = emb @ W_ih(fused) + b_gi (biases folded at prepare time, exact).
    tok  = ints_ref[0:T * BP, :]                                      # (T*BP,1) i32
    iota = jax.lax.broadcasted_iota(jnp.int32, (T * BP, NTOK_PAD), 1)
    onehot = (iota == tok).astype(f32)                                # (T*BP,64)
    ew = w_ref[R_EW:R_EW + NTOK_PAD, 0:H3]                            # (64, 96)
    gi_all = jnp.dot(onehot, ew, preferred_element_type=f32)          # (T*BP, 96)

    qlen  = ints_ref[T * BP:T * BP + BP, :]                           # (BP, 1) i32
    whh   = w_ref[R_WHH:R_WHH + H, 0:H3]                              # (32, 96)
    bhh_n = w_ref[R_BHN:R_BHN + 1, 0:H]                               # (1, 32)

    # ---------------------------- GRU recurrence ------------------------------
    # One fused (BP,H)@(H,3H) MXU push per step (skipped at t=0 since h==0);
    # fully unrolled; length masking == pack_padded_sequence final hidden.
    h = jnp.zeros((BP, H), f32)
    for t in range(T):                                                # static unroll
        gi = gi_all[t * BP:(t + 1) * BP, :]                           # (BP, 96)
        if t == 0:
            hh = jnp.zeros((BP, H3), f32)
        else:
            hh = jnp.dot(h, whh, preferred_element_type=f32)          # (BP, 96)
        r = jax.nn.sigmoid(gi[:, 0:H]      + hh[:, 0:H])
        z = jax.nn.sigmoid(gi[:, H:2 * H]  + hh[:, H:2 * H])
        n = jnp.tanh(gi[:, 2 * H:H3] + r * (hh[:, 2 * H:H3] + bhh_n))
        h_new = (1.0 - z) * n + z * h
        h = jnp.where(t < qlen, h_new, h)                             # advance while t < len
    q_out = h                                                         # (BP, H)

    # ---------------------------- UpDn attention ------------------------------
    v   = vis_ref[...][:, :, :DV]                                     # strip box coords
    v2d = v.reshape(BP * NOBJ, DV)
    wv = w_ref[R_WV:R_WV + DV, 0:M]
    bv = w_ref[R_BV:R_BV + 1, 0:M]
    vp = jnp.maximum(jnp.dot(v2d, wv, preferred_element_type=f32) + bv, 0.0)

    # one push for both q_out consumers: [att_wq | cls_w12]
    wqx = w_ref[R_WQX:R_WQX + H, 0:M + H]
    bqx = w_ref[R_BQX:R_BQX + 1, 0:M + H]
    qx  = jnp.dot(q_out, wqx, preferred_element_type=f32) + bqx       # (BP, 64)
    qp  = jnp.maximum(qx[:, 0:M], 0.0)                                # attention q proj (relu)
    x2  = qx[:, M:M + H]                                              # classifier lin12(q_out)

    joint = vp.reshape(BP, NOBJ, M) * qp[:, None, :]                  # (BP, NOBJ, M)
    wl = w_ref[R_WL:R_WL + M, 0:G]
    bl = w_ref[R_BL:R_BL + 1, 0:G]
    logits = (jnp.dot(joint.reshape(BP * NOBJ, M), wl,
                      preferred_element_type=f32) + bl).reshape(BP, NOBJ, G)

    # exact softmax over objects (dim=1)
    mx  = jnp.max(logits, axis=1, keepdims=True)
    e   = jnp.exp(logits - mx)
    att = e / jnp.sum(e, axis=1, keepdims=True)
    att_ref[...] = att

    # ------------------------------ Classifier --------------------------------
    # h_out = concat_g( sum_n att[:, n, g] * v[:, n, :] ); each glimpse feeds the
    # matching block-row of lin11 directly (never materialized in HBM).
    w11 = w_ref[R_W11:R_W11 + G * DV, 0:H]
    b11 = w_ref[R_B11:R_B11 + 1, 0:H]
    x1 = b11
    for g in range(G):                                                # G = 2, static
        h_g = jnp.sum(att[:, :, g:g + 1] * v, axis=1)                 # (BP, DV)
        x1 = x1 + jnp.dot(h_g, w11[g * DV:(g + 1) * DV, :],
                          preferred_element_type=f32)
    x = x1 * x2
    w2 = w_ref[R_W2:R_W2 + H, 0:H]
    b2 = w_ref[R_B2:R_B2 + 1, 0:H]
    x = jnp.maximum(jnp.dot(x, w2, preferred_element_type=f32) + b2, 0.0)
    w3 = w_ref[R_W3:R_W3 + H, 0:NCLS]
    b3 = w_ref[R_B3:R_B3 + 1, 0:NCLS]
    ans_ref[...] = jnp.dot(x, w3, preferred_element_type=f32) + b3


def updn_forward_call(ints, vis, wslab):
    return pl.pallas_call(
        net_kernel,
        out_shape=(jax.ShapeDtypeStruct((BP, NCLS), F32),
                   jax.ShapeDtypeStruct((BP, NOBJ, G), F32)),
        in_specs=[VMEM, VMEM, VMEM],
        out_specs=(VMEM, VMEM),
    )(ints, vis, wslab)


# ---------------------------------------------------------------------------
# Parameters (deterministic, synthetic): torch-layout init + kernel-layout prep
# ---------------------------------------------------------------------------
def init_params(key):
    ks = jax.random.split(key, 20)
    w = lambda k, shape, s=0.2: (s * jax.random.normal(k, shape)).astype(F32)
    return {
        "emb":      w(ks[0],  (NTOK, DW), 0.5),
        "gru_wih":  w(ks[1],  (DW, 3 * H)),    # fused r,z,n (transposed for x @ W)
        "gru_whh":  w(ks[2],  (H, 3 * H)),
        "gru_bih":  w(ks[3],  (1, 3 * H), 0.1),
        "gru_bhh":  w(ks[4],  (1, 3 * H), 0.1),
        "att_wv":   w(ks[5],  (DV, M)),
        "att_bv":   w(ks[6],  (1, M), 0.1),
        "att_wq":   w(ks[7],  (H, M)),
        "att_bq":   w(ks[8],  (1, M), 0.1),
        "att_wl":   w(ks[9],  (M, G)),
        "att_bl":   w(ks[10], (1, G), 0.1),
        "cls_w11":  w(ks[11], (G * DV, H)),
        "cls_b11":  w(ks[12], (1, H), 0.1),
        "cls_w12":  w(ks[13], (H, H)),
        "cls_b12":  w(ks[14], (1, H), 0.1),
        "cls_w2":   w(ks[15], (H, H)),
        "cls_b2":   w(ks[16], (1, H), 0.1),
        "cls_w3":   w(ks[17], (H, NCLS)),
        "cls_b3":   w(ks[18], (1, NCLS), 0.1),
    }


def prepare_params(p):
    """One-time re-layout: fold embedding + input projection + biases, fuse the
    two q_out consumers, and pack everything into a single (376,128) VMEM slab
    with static 8-aligned row offsets (3 input DMAs total instead of 27)."""
    hi = jax.lax.Precision.HIGHEST
    emb_pad = jnp.zeros((NTOK_PAD, DW), F32).at[:NTOK].set(p["emb"])
    # gi bias: bih+bhh for r/z (additive), bih only for n (bhh_n stays inside r*(...))
    b_gi = jnp.concatenate(
        [p["gru_bih"][:, 0:H] + p["gru_bhh"][:, 0:H],
         p["gru_bih"][:, H:2 * H] + p["gru_bhh"][:, H:2 * H],
         p["gru_bih"][:, 2 * H:3 * H]], axis=1)                       # (1, 96)
    # exact: onehot @ (emb@Wih + b_gi) == Embedding(q) @ Wih + b_gi
    ew  = jnp.dot(emb_pad, p["gru_wih"], precision=hi) + b_gi         # (64, 96)
    wqx = jnp.concatenate([p["att_wq"], p["cls_w12"]], axis=1)        # (32, 64)
    bqx = jnp.concatenate([p["att_bq"], p["cls_b12"]], axis=1)        # (1, 64)

    slab = jnp.zeros((R_TOTAL, 128), F32)
    def put(s, r, m):
        return s.at[r:r + m.shape[0], :m.shape[1]].set(m.astype(F32))
    slab = put(slab, R_EW,  ew)
    slab = put(slab, R_WHH, p["gru_whh"])
    slab = put(slab, R_BHN, p["gru_bhh"][:, 2 * H:3 * H])
    slab = put(slab, R_WV,  p["att_wv"])
    slab = put(slab, R_BV,  p["att_bv"])
    slab = put(slab, R_WQX, wqx)
    slab = put(slab, R_BQX, bqx)
    slab = put(slab, R_WL,  p["att_wl"])
    slab = put(slab, R_BL,  p["att_bl"])
    slab = put(slab, R_W11, p["cls_w11"])
    slab = put(slab, R_B11, p["cls_b11"])
    slab = put(slab, R_W2,  p["cls_w2"])
    slab = put(slab, R_B2,  p["cls_b2"])
    slab = put(slab, R_W3,  p["cls_w3"])
    slab = put(slab, R_B3,  p["cls_b3"])
    return {"wslab": slab}


# ---------------------------------------------------------------------------
# Net.forward  (e_s, e_e, e_mask, e_label, q_mask, r_mask are unused, as in torch)
# ---------------------------------------------------------------------------
def net_forward(kp, q, vision, e_s, e_e, e_mask, e_label, q_mask, r_mask, q_len):
    b = q.shape[0]
    pad = BP - b
    # pad batch to the 8-sublane granule (padded rows: token 0, q_len 0, zero
    # vision -> harmless garbage rows, sliced away below)
    q_p    = jnp.pad(q.astype(jnp.int32), ((0, pad), (0, 0)))          # (BP, T)
    qlen_p = jnp.pad(q_len.astype(jnp.int32), (0, pad))                # (BP,)
    vis_p  = jnp.pad(vision, ((0, pad), (0, 0), (0, 0)))               # (BP, NOBJ, DV+4)
    # tokens in (t, b) order + q_len packed into one int32 slab (single DMA)
    ints = jnp.concatenate([q_p.T.reshape(T * BP, 1),
                            qlen_p.reshape(BP, 1)], axis=0)            # (T*BP+BP, 1)

    answer, att = updn_forward_call(ints, vis_p, kp["wslab"])
    # loss_time = zeros_like(v).mean() in torch is a constant 0.0 and not returned.
    return answer[:b], att[:b]


# ---------------------------------------------------------------------------
# Pure-JAX reference (mirrors the torch forward; used only for the self-check)
# ---------------------------------------------------------------------------
def reference_forward(p, q, vision, q_len):
    hi = jax.lax.Precision.HIGHEST
    bsz = q.shape[0]
    v = vision[:, :, :DV]
    wemb = p["emb"][q.T]                                               # (T, B, DW)
    h = jnp.zeros((bsz, H), F32)
    for t in range(T):
        gi = jnp.dot(wemb[t], p["gru_wih"], precision=hi) + p["gru_bih"]
        gh = jnp.dot(h, p["gru_whh"], precision=hi) + p["gru_bhh"]
        r = jax.nn.sigmoid(gi[:, 0:H] + gh[:, 0:H])
        z = jax.nn.sigmoid(gi[:, H:2 * H] + gh[:, H:2 * H])
        n = jnp.tanh(gi[:, 2 * H:] + r * gh[:, 2 * H:])
        h_new = (1.0 - z) * n + z * h
        h = jnp.where(t < q_len[:, None], h_new, h)
    q_out = h
    vp = jax.nn.relu(jnp.dot(v.reshape(-1, DV), p["att_wv"], precision=hi)
                     + p["att_bv"]).reshape(bsz, NOBJ, M)
    qp = jax.nn.relu(jnp.dot(q_out, p["att_wq"], precision=hi) + p["att_bq"])
    joint = vp * qp[:, None, :]
    logits = (jnp.dot(joint.reshape(-1, M), p["att_wl"], precision=hi)
              + p["att_bl"]).reshape(bsz, NOBJ, G)
    att = jax.nn.softmax(logits, axis=1)
    h_out = jnp.concatenate(
        [jnp.sum(att[:, :, g:g + 1] * v, axis=1) for g in range(G)], axis=1)
    x1 = jnp.dot(h_out, p["cls_w11"], precision=hi) + p["cls_b11"]
    x2 = jnp.dot(q_out, p["cls_w12"], precision=hi) + p["cls_b12"]
    x = x1 * x2
    x = jax.nn.relu(jnp.dot(x, p["cls_w2"], precision=hi) + p["cls_b2"])
    ans = jnp.dot(x, p["cls_w3"], precision=hi) + p["cls_b3"]
    return ans, att


if __name__ == "__main__":
    key = jax.random.PRNGKey(0)
    k_p, k_q, k_v = jax.random.split(key, 3)
    params = init_params(k_p)
    kparams = prepare_params(params)

    q = jax.random.randint(k_q, (B, T), 0, NTOK, dtype=jnp.int32)
    vision = jax.random.normal(k_v, (B, NOBJ, DV + 4), dtype=jnp.float32)
    q_len = jnp.array([T, T - 3], dtype=jnp.int32)

    # unused extras (kept to mirror the torch forward signature)
    e_s = e_e = e_label = jnp.zeros((B, 4), jnp.int32)
    e_mask = q_mask = r_mask = jnp.zeros((B, T), jnp.float32)

    fwd = jax.jit(net_forward)
    answer, att = fwd(kparams, q, vision, e_s, e_e, e_mask, e_label,
                      q_mask, r_mask, q_len)
    jax.block_until_ready((answer, att))

    assert answer.shape == (B, NCLS) and att.shape == (B, NOBJ, G)
    # exact softmax: attention must normalize over objects
    assert bool(jnp.all(jnp.abs(att.sum(axis=1) - 1.0) < 1e-3))

    # loose numeric check against the pure-JAX reference (tolerance covers any
    # MXU-vs-XLA matmul precision difference at these magnitudes)
    ans_ref, att_ref = reference_forward(params, q, vision, q_len)
    assert float(jnp.max(jnp.abs(answer - ans_ref))) < 2e-2
    assert float(jnp.max(jnp.abs(att - att_ref))) < 2e-2
    print("KERNEL_OK")
</pallas_src>

<mosaic_0001>
module attributes {stable_mosaic.version = 11 : i64} {
  func.func @net_kernel(%arg0: memref<72x1xi32, #tpu.memory_space<vmem>>, %arg1: memref<8x8x36xf32, #tpu.memory_space<vmem>>, %arg2: memref<376x128xf32, #tpu.memory_space<vmem>>, %arg3: memref<8x16xf32, #tpu.memory_space<vmem>>, %arg4: memref<8x8x2xf32, #tpu.memory_space<vmem>>) attributes {dimension_semantics = [], scalar_prefetch = 0 : i64, scratch_operands = 0 : i64, tpu.core_type = #tpu.core_type<tc>} {
    %c0 = arith.constant 0 : index
    %c0_0 = arith.constant 0 : index
    %0 = vector.load %arg0[%c0, %c0_0] : memref<72x1xi32, #tpu.memory_space<vmem>>, vector<64x1xi32>
    %1 = tpu.iota {dimensions = array<i32: 1>} : vector<64x64xi32>
    %2 = vector.broadcast %0 : vector<64x1xi32> to vector<64x64xi32>
    %3 = arith.cmpi eq, %1, %2 : vector<64x64xi32>
    %4 = arith.extui %3 : vector<64x64xi1> to vector<64x64xi32>
    %5 = arith.sitofp %4 : vector<64x64xi32> to vector<64x64xf32>
    %c0_1 = arith.constant 0 : index
    %c0_2 = arith.constant 0 : index
    %6 = vector.load %arg2[%c0_1, %c0_2] : memref<376x128xf32, #tpu.memory_space<vmem>>, vector<64x96xf32>
    %cst = arith.constant dense<0.000000e+00> : vector<64x96xf32>
    %7 = tpu.matmul %5, %6, %cst {dimension_numbers = #tpu.dot_dimension_numbers<[1], [0], [0], [1], [0, 0, 1, 1], [], []>} : vector<64x64xf32>, vector<64x96xf32>, vector<64x96xf32> -> vector<64x96xf32>
    %c64 = arith.constant 64 : index
    %c0_3 = arith.constant 0 : index
    %8 = vector.load %arg0[%c64, %c0_3] : memref<72x1xi32, #tpu.memory_space<vmem>>, vector<8x1xi32>
    %c64_4 = arith.constant 64 : index
    %c0_5 = arith.constant 0 : index
    %9 = vector.load %arg2[%c64_4, %c0_5] : memref<376x128xf32, #tpu.memory_space<vmem>>, vector<32x96xf32>
    %c96 = arith.constant 96 : index
    %c0_6 = arith.constant 0 : index
    %10 = vector.load %arg2[%c96, %c0_6] : memref<376x128xf32, #tpu.memory_space<vmem>>, vector<1x32xf32>
    %cst_7 = arith.constant 0.000000e+00 : f32
    %11 = vector.broadcast %cst_7 : f32 to vector<8x32xf32>
    %12 = vector.extract_strided_slice %7 {offsets = [0, 0], sizes = [8, 96], strides = [1, 1]} : vector<64x96xf32> to vector<8x96xf32>
    %cst_8 = arith.constant 0.000000e+00 : f32
    %13 = vector.broadcast %cst_8 : f32 to vector<8x96xf32>
    %14 = vector.extract_strided_slice %12 {offsets = [0, 0], sizes = [8, 32], strides = [1, 1]} : vector<8x96xf32> to vector<8x32xf32>
    %15 = vector.extract_strided_slice %13 {offsets = [0, 0], sizes = [8, 32], strides = [1, 1]} : vector<8x96xf32> to vector<8x32xf32>
    %16 = arith.addf %14, %15 : vector<8x32xf32>
    %17 = arith.negf %16 : vector<8x32xf32>
    %18 = math.exp %17 : vector<8x32xf32>
    %cst_9 = arith.constant 1.000000e+00 : f32
    %19 = vector.broadcast %cst_9 : f32 to vector<8x32xf32>
    %20 = arith.addf %19, %18 : vector<8x32xf32>
    %21 = arith.divf %19, %20 : vector<8x32xf32>
    %22 = vector.extract_strided_slice %12 {offsets = [0, 32], sizes = [8, 32], strides = [1, 1]} : vector<8x96xf32> to vector<8x32xf32>
    %23 = vector.extract_strided_slice %13 {offsets = [0, 32], sizes = [8, 32], strides = [1, 1]} : vector<8x96xf32> to vector<8x32xf32>
    %24 = arith.addf %22, %23 : vector<8x32xf32>
    %25 = arith.negf %24 : vector<8x32xf32>
    %26 = math.exp %25 : vector<8x32xf32>
    %cst_10 = arith.constant 1.000000e+00 : f32
    %27 = vector.broadcast %cst_10 : f32 to vector<8x32xf32>
    %28 = arith.addf %27, %26 : vector<8x32xf32>
    %29 = arith.divf %27, %28 : vector<8x32xf32>
    %30 = vector.extract_strided_slice %12 {offsets = [0, 64], sizes = [8, 32], strides = [1, 1]} : vector<8x96xf32> to vector<8x32xf32>
    %31 = vector.extract_strided_slice %13 {offsets = [0, 64], sizes = [8, 32], strides = [1, 1]} : vector<8x96xf32> to vector<8x32xf32>
    %32 = vector.broadcast %10 : vector<1x32xf32> to vector<8x32xf32>
    %33 = arith.addf %31, %32 : vector<8x32xf32>
    %34 = arith.mulf %21, %33 : vector<8x32xf32>
    %35 = arith.addf %30, %34 : vector<8x32xf32>
    %36 = math.tanh %35 : vector<8x32xf32>
    %cst_11 = arith.constant 1.000000e+00 : f32
    %37 = vector.broadcast %cst_11 : f32 to vector<8x32xf32>
    %38 = arith.subf %37, %29 : vector<8x32xf32>
    %39 = arith.mulf %38, %36 : vector<8x32xf32>
    %40 = arith.mulf %29, %11 : vector<8x32xf32>
    %41 = arith.addf %39, %40 : vector<8x32xf32>
    %c0_i32 = arith.constant 0 : i32
    %42 = vector.broadcast %c0_i32 : i32 to vector<8x1xi32>
    %43 = arith.cmpi sgt, %8, %42 : vector<8x1xi32>
    %44 = vector.shape_cast %43 : vector<8x1xi1> to vector<8x1xi1>
    %45 = vector.broadcast %44 : vector<8x1xi1> to vector<8x32xi1>
    %46 = arith.select %45, %41, %11 : vector<8x32xi1>, vector<8x32xf32>
    %47 = vector.extract_strided_slice %7 {offsets = [8, 0], sizes = [8, 96], strides = [1, 1]} : vector<64x96xf32> to vector<8x96xf32>
    %cst_12 = arith.constant dense<0.000000e+00> : vector<8x96xf32>
    %48 = tpu.matmul %46, %9, %cst_12 {dimension_numbers = #tpu.dot_dimension_numbers<[1], [0], [0], [1], [0, 0, 1, 1], [], []>} : vector<8x32xf32>, vector<32x96xf32>, vector<8x96xf32> -> vector<8x96xf32>
    %49 = vector.extract_strided_slice %47 {offsets = [0, 0], sizes = [8, 32], strides = [1, 1]} : vector<8x96xf32> to vector<8x32xf32>
    %50 = vector.extract_strided_slice %48 {offsets = [0, 0], sizes = [8, 32], strides = [1, 1]} : vector<8x96xf32> to vector<8x32xf32>
    %51 = arith.addf %49, %50 : vector<8x32xf32>
    %52 = arith.negf %51 : vector<8x32xf32>
    %53 = math.exp %52 : vector<8x32xf32>
    %cst_13 = arith.constant 1.000000e+00 : f32
    %54 = vector.broadcast %cst_13 : f32 to vector<8x32xf32>
    %55 = arith.addf %54, %53 : vector<8x32xf32>
    %56 = arith.divf %54, %55 : vector<8x32xf32>
    %57 = vector.extract_strided_slice %47 {offsets = [0, 32], sizes = [8, 32], strides = [1, 1]} : vector<8x96xf32> to vector<8x32xf32>
    %58 = vector.extract_strided_slice %48 {offsets = [0, 32], sizes = [8, 32], strides = [1, 1]} : vector<8x96xf32> to vector<8x32xf32>
    %59 = arith.addf %57, %58 : vector<8x32xf32>
    %60 = arith.negf %59 : vector<8x32xf32>
    %61 = math.exp %60 : vector<8x32xf32>
    %cst_14 = arith.constant 1.000000e+00 : f32
    %62 = vector.broadcast %cst_14 : f32 to vector<8x32xf32>
    %63 = arith.addf %62, %61 : vector<8x32xf32>
    %64 = arith.divf %62, %63 : vector<8x32xf32>
    %65 = vector.extract_strided_slice %47 {offsets = [0, 64], sizes = [8, 32], strides = [1, 1]} : vector<8x96xf32> to vector<8x32xf32>
    %66 = vector.extract_strided_slice %48 {offsets = [0, 64], sizes = [8, 32], strides = [1, 1]} : vector<8x96xf32> to vector<8x32xf32>
    %67 = vector.broadcast %10 : vector<1x32xf32> to vector<8x32xf32>
    %68 = arith.addf %66, %67 : vector<8x32xf32>
    %69 = arith.mulf %56, %68 : vector<8x32xf32>
    %70 = arith.addf %65, %69 : vector<8x32xf32>
    %71 = math.tanh %70 : vector<8x32xf32>
    %cst_15 = arith.constant 1.000000e+00 : f32
    %72 = vector.broadcast %cst_15 : f32 to vector<8x32xf32>
    %73 = arith.subf %72, %64 : vector<8x32xf32>
    %74 = arith.mulf %73, %71 : vector<8x32xf32>
    %75 = arith.mulf %64, %46 : vector<8x32xf32>
    %76 = arith.addf %74, %75 : vector<8x32xf32>
    %c1_i32 = arith.constant 1 : i32
    %77 = vector.broadcast %c1_i32 : i32 to vector<8x1xi32>
    %78 = arith.cmpi sgt, %8, %77 : vector<8x1xi32>
    %79 = vector.shape_cast %78 : vector<8x1xi1> to vector<8x1xi1>
    %80 = vector.broadcast %79 : vector<8x1xi1> to vector<8x32xi1>
    %81 = arith.select %80, %76, %46 : vector<8x32xi1>, vector<8x32xf32>
    %82 = vector.extract_strided_slice %7 {offsets = [16, 0], sizes = [8, 96], strides = [1, 1]} : vector<64x96xf32> to vector<8x96xf32>
    %cst_16 = arith.constant dense<0.000000e+00> : vector<8x96xf32>
    %83 = tpu.matmul %81, %9, %cst_16 {dimension_numbers = #tpu.dot_dimension_numbers<[1], [0], [0], [1], [0, 0, 1, 1], [], []>} : vector<8x32xf32>, vector<32x96xf32>, vector<8x96xf32> -> vector<8x96xf32>
    %84 = vector.extract_strided_slice %82 {offsets = [0, 0], sizes = [8, 32], strides = [1, 1]} : vector<8x96xf32> to vector<8x32xf32>
    %85 = vector.extract_strided_slice %83 {offsets = [0, 0], sizes = [8, 32], strides = [1, 1]} : vector<8x96xf32> to vector<8x32xf32>
    %86 = arith.addf %84, %85 : vector<8x32xf32>
    %87 = arith.negf %86 : vector<8x32xf32>
    %88 = math.exp %87 : vector<8x32xf32>
    %cst_17 = arith.constant 1.000000e+00 : f32
    %89 = vector.broadcast %cst_17 : f32 to vector<8x32xf32>
    %90 = arith.addf %89, %88 : vector<8x32xf32>
    %91 = arith.divf %89, %90 : vector<8x32xf32>
    %92 = vector.extract_strided_slice %82 {offsets = [0, 32], sizes = [8, 32], strides = [1, 1]} : vector<8x96xf32> to vector<8x32xf32>
    %93 = vector.extract_strided_slice %83 {offsets = [0, 32], sizes = [8, 32], strides = [1, 1]} : vector<8x96xf32> to vector<8x32xf32>
    %94 = arith.addf %92, %93 : vector<8x32xf32>
    %95 = arith.negf %94 : vector<8x32xf32>
    %96 = math.exp %95 : vector<8x32xf32>
    %cst_18 = arith.constant 1.000000e+00 : f32
    %97 = vector.broadcast %cst_18 : f32 to vector<8x32xf32>
    %98 = arith.addf %97, %96 : vector<8x32xf32>
    %99 = arith.divf %97, %98 : vector<8x32xf32>
    %100 = vector.extract_strided_slice %82 {offsets = [0, 64], sizes = [8, 32], strides = [1, 1]} : vector<8x96xf32> to vector<8x32xf32>
    %101 = vector.extract_strided_slice %83 {offsets = [0, 64], sizes = [8, 32], strides = [1, 1]} : vector<8x96xf32> to vector<8x32xf32>
    %102 = vector.broadcast %10 : vector<1x32xf32> to vector<8x32xf32>
    %103 = arith.addf %101, %102 : vector<8x32xf32>
    %104 = arith.mulf %91, %103 : vector<8x32xf32>
    %105 = arith.addf %100, %104 : vector<8x32xf32>
    %106 = math.tanh %105 : vector<8x32xf32>
    %cst_19 = arith.constant 1.000000e+00 : f32
    %107 = vector.broadcast %cst_19 : f32 to vector<8x32xf32>
    %108 = arith.subf %107, %99 : vector<8x32xf32>
    %109 = arith.mulf %108, %106 : vector<8x32xf32>
    %110 = arith.mulf %99, %81 : vector<8x32xf32>
    %111 = arith.addf %109, %110 : vector<8x32xf32>
    %c2_i32 = arith.constant 2 : i32
    %112 = vector.broadcast %c2_i32 : i32 to vector<8x1xi32>
    %113 = arith.cmpi sgt, %8, %112 : vector<8x1xi32>
    %114 = vector.shape_cast %113 : vector<8x1xi1> to vector<8x1xi1>
    %115 = vector.broadcast %114 : vector<8x1xi1> to vector<8x32xi1>
    %116 = arith.select %115, %111, %81 : vector<8x32xi1>, vector<8x32xf32>
    %117 = vector.extract_strided_slice %7 {offsets = [24, 0], sizes = [8, 96], strides = [1, 1]} : vector<64x96xf32> to vector<8x96xf32>
    %cst_20 = arith.constant dense<0.000000e+00> : vector<8x96xf32>
    %118 = tpu.matmul %116, %9, %cst_20 {dimension_numbers = #tpu.dot_dimension_numbers<[1], [0], [0], [1], [0, 0, 1, 1], [], []>} : vector<8x32xf32>, vector<32x96xf32>, vector<8x96xf32> -> vector<8x96xf32>
    %119 = vector.extract_strided_slice %117 {offsets = [0, 0], sizes = [8, 32], strides = [1, 1]} : vector<8x96xf32> to vector<8x32xf32>
    %120 = vector.extract_strided_slice %118 {offsets = [0, 0], sizes = [8, 32], strides = [1, 1]} : vector<8x96xf32> to vector<8x32xf32>
    %121 = arith.addf %119, %120 : vector<8x32xf32>
    %122 = arith.negf %121 : vector<8x32xf32>
    %123 = math.exp %122 : vector<8x32xf32>
    %cst_21 = arith.constant 1.000000e+00 : f32
    %124 = vector.broadcast %cst_21 : f32 to vector<8x32xf32>
    %125 = arith.addf %124, %123 : vector<8x32xf32>
    %126 = arith.divf %124, %125 : vector<8x32xf32>
    %127 = vector.extract_strided_slice %117 {offsets = [0, 32], sizes = [8, 32], strides = [1, 1]} : vector<8x96xf32> to vector<8x32xf32>
    %128 = vector.extract_strided_slice %118 {offsets = [0, 32], sizes = [8, 32], strides = [1, 1]} : vector<8x96xf32> to vector<8x32xf32>
    %129 = arith.addf %127, %128 : vector<8x32xf32>
    %130 = arith.negf %129 : vector<8x32xf32>
    %131 = math.exp %130 : vector<8x32xf32>
    %cst_22 = arith.constant 1.000000e+00 : f32
    %132 = vector.broadcast %cst_22 : f32 to vector<8x32xf32>
    %133 = arith.addf %132, %131 : vector<8x32xf32>
    %134 = arith.divf %132, %133 : vector<8x32xf32>
    %135 = vector.extract_strided_slice %117 {offsets = [0, 64], sizes = [8, 32], strides = [1, 1]} : vector<8x96xf32> to vector<8x32xf32>
    %136 = vector.extract_strided_slice %118 {offsets = [0, 64], sizes = [8, 32], strides = [1, 1]} : vector<8x96xf32> to vector<8x32xf32>
    %137 = vector.broadcast %10 : vector<1x32xf32> to vector<8x32xf32>
    %138 = arith.addf %136, %137 : vector<8x32xf32>
    %139 = arith.mulf %126, %138 : vector<8x32xf32>
    %140 = arith.addf %135, %139 : vector<8x32xf32>
    %141 = math.tanh %140 : vector<8x32xf32>
    %cst_23 = arith.constant 1.000000e+00 : f32
    %142 = vector.broadcast %cst_23 : f32 to vector<8x32xf32>
    %143 = arith.subf %142, %134 : vector<8x32xf32>
    %144 = arith.mulf %143, %141 : vector<8x32xf32>
    %145 = arith.mulf %134, %116 : vector<8x32xf32>
    %146 = arith.addf %144, %145 : vector<8x32xf32>
    %c3_i32 = arith.constant 3 : i32
    %147 = vector.broadcast %c3_i32 : i32 to vector<8x1xi32>
    %148 = arith.cmpi sgt, %8, %147 : vector<8x1xi32>
    %149 = vector.shape_cast %148 : vector<8x1xi1> to vector<8x1xi1>
    %150 = vector.broadcast %149 : vector<8x1xi1> to vector<8x32xi1>
    %151 = arith.select %150, %146, %116 : vector<8x32xi1>, vector<8x32xf32>
    %152 = vector.extract_strided_slice %7 {offsets = [32, 0], sizes = [8, 96], strides = [1, 1]} : vector<64x96xf32> to vector<8x96xf32>
    %cst_24 = arith.constant dense<0.000000e+00> : vector<8x96xf32>
    %153 = tpu.matmul %151, %9, %cst_24 {dimension_numbers = #tpu.dot_dimension_numbers<[1], [0], [0], [1], [0, 0, 1, 1], [], []>} : vector<8x32xf32>, vector<32x96xf32>, vector<8x96xf32> -> vector<8x96xf32>
    %154 = vector.extract_strided_slice %152 {offsets = [0, 0], sizes = [8, 32], strides = [1, 1]} : vector<8x96xf32> to vector<8x32xf32>
    %155 = vector.extract_strided_slice %153 {offsets = [0, 0], sizes = [8, 32], strides = [1, 1]} : vector<8x96xf32> to vector<8x32xf32>
    %156 = arith.addf %154, %155 : vector<8x32xf32>
    %157 = arith.negf %156 : vector<8x32xf32>
    %158 = math.exp %157 : vector<8x32xf32>
    %cst_25 = arith.constant 1.000000e+00 : f32
    %159 = vector.broadcast %cst_25 : f32 to vector<8x32xf32>
    %160 = arith.addf %159, %158 : vector<8x32xf32>
    %161 = arith.divf %159, %160 : vector<8x32xf32>
    %162 = vector.extract_strided_slice %152 {offsets = [0, 32], sizes = [8, 32], strides = [1, 1]} : vector<8x96xf32> to vector<8x32xf32>
    %163 = vector.extract_strided_slice %153 {offsets = [0, 32], sizes = [8, 32], strides = [1, 1]} : vector<8x96xf32> to vector<8x32xf32>
    %164 = arith.addf %162, %163 : vector<8x32xf32>
    %165 = arith.negf %164 : vector<8x32xf32>
    %166 = math.exp %165 : vector<8x32xf32>
    %cst_26 = arith.constant 1.000000e+00 : f32
    %167 = vector.broadcast %cst_26 : f32 to vector<8x32xf32>
    %168 = arith.addf %167, %166 : vector<8x32xf32>
    %169 = arith.divf %167, %168 : vector<8x32xf32>
    %170 = vector.extract_strided_slice %152 {offsets = [0, 64], sizes = [8, 32], strides = [1, 1]} : vector<8x96xf32> to vector<8x32xf32>
    %171 = vector.extract_strided_slice %153 {offsets = [0, 64], sizes = [8, 32], strides = [1, 1]} : vector<8x96xf32> to vector<8x32xf32>
    %172 = vector.broadcast %10 : vector<1x32xf32> to vector<8x32xf32>
    %173 = arith.addf %171, %172 : vector<8x32xf32>
    %174 = arith.mulf %161, %173 : vector<8x32xf32>
    %175 = arith.addf %170, %174 : vector<8x32xf32>
    %176 = math.tanh %175 : vector<8x32xf32>
    %cst_27 = arith.constant 1.000000e+00 : f32
    %177 = vector.broadcast %cst_27 : f32 to vector<8x32xf32>
    %178 = arith.subf %177, %169 : vector<8x32xf32>
    %179 = arith.mulf %178, %176 : vector<8x32xf32>
    %180 = arith.mulf %169, %151 : vector<8x32xf32>
    %181 = arith.addf %179, %180 : vector<8x32xf32>
    %c4_i32 = arith.constant 4 : i32
    %182 = vector.broadcast %c4_i32 : i32 to vector<8x1xi32>
    %183 = arith.cmpi sgt, %8, %182 : vector<8x1xi32>
    %184 = vector.shape_cast %183 : vector<8x1xi1> to vector<8x1xi1>
    %185 = vector.broadcast %184 : vector<8x1xi1> to vector<8x32xi1>
    %186 = arith.select %185, %181, %151 : vector<8x32xi1>, vector<8x32xf32>
    %187 = vector.extract_strided_slice %7 {offsets = [40, 0], sizes = [8, 96], strides = [1, 1]} : vector<64x96xf32> to vector<8x96xf32>
    %cst_28 = arith.constant dense<0.000000e+00> : vector<8x96xf32>
    %188 = tpu.matmul %186, %9, %cst_28 {dimension_numbers = #tpu.dot_dimension_numbers<[1], [0], [0], [1], [0, 0, 1, 1], [], []>} : vector<8x32xf32>, vector<32x96xf32>, vector<8x96xf32> -> vector<8x96xf32>
    %189 = vector.extract_strided_slice %187 {offsets = [0, 0], sizes = [8, 32], strides = [1, 1]} : vector<8x96xf32> to vector<8x32xf32>
    %190 = vector.extract_strided_slice %188 {offsets = [0, 0], sizes = [8, 32], strides = [1, 1]} : vector<8x96xf32> to vector<8x32xf32>
    %191 = arith.addf %189, %190 : vector<8x32xf32>
    %192 = arith.negf %191 : vector<8x32xf32>
    %193 = math.exp %192 : vector<8x32xf32>
    %cst_29 = arith.constant 1.000000e+00 : f32
    %194 = vector.broadcast %cst_29 : f32 to vector<8x32xf32>
    %195 = arith.addf %194, %193 : vector<8x32xf32>
    %196 = arith.divf %194, %195 : vector<8x32xf32>
    %197 = vector.extract_strided_slice %187 {offsets = [0, 32], sizes = [8, 32], strides = [1, 1]} : vector<8x96xf32> to vector<8x32xf32>
    %198 = vector.extract_strided_slice %188 {offsets = [0, 32], sizes = [8, 32], strides = [1, 1]} : vector<8x96xf32> to vector<8x32xf32>
    %199 = arith.addf %197, %198 : vector<8x32xf32>
    %200 = arith.negf %199 : vector<8x32xf32>
    %201 = math.exp %200 : vector<8x32xf32>
    %cst_30 = arith.constant 1.000000e+00 : f32
    %202 = vector.broadcast %cst_30 : f32 to vector<8x32xf32>
    %203 = arith.addf %202, %201 : vector<8x32xf32>
    %204 = arith.divf %202, %203 : vector<8x32xf32>
    %205 = vector.extract_strided_slice %187 {offsets = [0, 64], sizes = [8, 32], strides = [1, 1]} : vector<8x96xf32> to vector<8x32xf32>
    %206 = vector.extract_strided_slice %188 {offsets = [0, 64], sizes = [8, 32], strides = [1, 1]} : vector<8x96xf32> to vector<8x32xf32>
    %207 = vector.broadcast %10 : vector<1x32xf32> to vector<8x32xf32>
    %208 = arith.addf %206, %207 : vector<8x32xf32>
    %209 = arith.mulf %196, %208 : vector<8x32xf32>
    %210 = arith.addf %205, %209 : vector<8x32xf32>
    %211 = math.tanh %210 : vector<8x32xf32>
    %cst_31 = arith.constant 1.000000e+00 : f32
    %212 = vector.broadcast %cst_31 : f32 to vector<8x32xf32>
    %213 = arith.subf %212, %204 : vector<8x32xf32>
    %214 = arith.mulf %213, %211 : vector<8x32xf32>
    %215 = arith.mulf %204, %186 : vector<8x32xf32>
    %216 = arith.addf %214, %215 : vector<8x32xf32>
    %c5_i32 = arith.constant 5 : i32
    %217 = vector.broadcast %c5_i32 : i32 to vector<8x1xi32>
    %218 = arith.cmpi sgt, %8, %217 : vector<8x1xi32>
    %219 = vector.shape_cast %218 : vector<8x1xi1> to vector<8x1xi1>
    %220 = vector.broadcast %219 : vector<8x1xi1> to vector<8x32xi1>
    %221 = arith.select %220, %216, %186 : vector<8x32xi1>, vector<8x32xf32>
    %222 = vector.extract_strided_slice %7 {offsets = [48, 0], sizes = [8, 96], strides = [1, 1]} : vector<64x96xf32> to vector<8x96xf32>
    %cst_32 = arith.constant dense<0.000000e+00> : vector<8x96xf32>
    %223 = tpu.matmul %221, %9, %cst_32 {dimension_numbers = #tpu.dot_dimension_numbers<[1], [0], [0], [1], [0, 0, 1, 1], [], []>} : vector<8x32xf32>, vector<32x96xf32>, vector<8x96xf32> -> vector<8x96xf32>
    %224 = vector.extract_strided_slice %222 {offsets = [0, 0], sizes = [8, 32], strides = [1, 1]} : vector<8x96xf32> to vector<8x32xf32>
    %225 = vector.extract_strided_slice %223 {offsets = [0, 0], sizes = [8, 32], strides = [1, 1]} : vector<8x96xf32> to vector<8x32xf32>
    %226 = arith.addf %224, %225 : vector<8x32xf32>
    %227 = arith.negf %226 : vector<8x32xf32>
    %228 = math.exp %227 : vector<8x32xf32>
    %cst_33 = arith.constant 1.000000e+00 : f32
    %229 = vector.broadcast %cst_33 : f32 to vector<8x32xf32>
    %230 = arith.addf %229, %228 : vector<8x32xf32>
    %231 = arith.divf %229, %230 : vector<8x32xf32>
    %232 = vector.extract_strided_slice %222 {offsets = [0, 32], sizes = [8, 32], strides = [1, 1]} : vector<8x96xf32> to vector<8x32xf32>
    %233 = vector.extract_strided_slice %223 {offsets = [0, 32], sizes = [8, 32], strides = [1, 1]} : vector<8x96xf32> to vector<8x32xf32>
    %234 = arith.addf %232, %233 : vector<8x32xf32>
    %235 = arith.negf %234 : vector<8x32xf32>
    %236 = math.exp %235 : vector<8x32xf32>
    %cst_34 = arith.constant 1.000000e+00 : f32
    %237 = vector.broadcast %cst_34 : f32 to vector<8x32xf32>
    %238 = arith.addf %237, %236 : vector<8x32xf32>
    %239 = arith.divf %237, %238 : vector<8x32xf32>
    %240 = vector.extract_strided_slice %222 {offsets = [0, 64], sizes = [8, 32], strides = [1, 1]} : vector<8x96xf32> to vector<8x32xf32>
    %241 = vector.extract_strided_slice %223 {offsets = [0, 64], sizes = [8, 32], strides = [1, 1]} : vector<8x96xf32> to vector<8x32xf32>
    %242 = vector.broadcast %10 : vector<1x32xf32> to vector<8x32xf32>
    %243 = arith.addf %241, %242 : vector<8x32xf32>
    %244 = arith.mulf %231, %243 : vector<8x32xf32>
    %245 = arith.addf %240, %244 : vector<8x32xf32>
    %246 = math.tanh %245 : vector<8x32xf32>
    %cst_35 = arith.constant 1.000000e+00 : f32
    %247 = vector.broadcast %cst_35 : f32 to vector<8x32xf32>
    %248 = arith.subf %247, %239 : vector<8x32xf32>
    %249 = arith.mulf %248, %246 : vector<8x32xf32>
    %250 = arith.mulf %239, %221 : vector<8x32xf32>
    %251 = arith.addf %249, %250 : vector<8x32xf32>
    %c6_i32 = arith.constant 6 : i32
    %252 = vector.broadcast %c6_i32 : i32 to vector<8x1xi32>
    %253 = arith.cmpi sgt, %8, %252 : vector<8x1xi32>
    %254 = vector.shape_cast %253 : vector<8x1xi1> to vector<8x1xi1>
    %255 = vector.broadcast %254 : vector<8x1xi1> to vector<8x32xi1>
    %256 = arith.select %255, %251, %221 : vector<8x32xi1>, vector<8x32xf32>
    %257 = vector.extract_strided_slice %7 {offsets = [56, 0], sizes = [8, 96], strides = [1, 1]} : vector<64x96xf32> to vector<8x96xf32>
    %cst_36 = arith.constant dense<0.000000e+00> : vector<8x96xf32>
    %258 = tpu.matmul %256, %9, %cst_36 {dimension_numbers = #tpu.dot_dimension_numbers<[1], [0], [0], [1], [0, 0, 1, 1], [], []>} : vector<8x32xf32>, vector<32x96xf32>, vector<8x96xf32> -> vector<8x96xf32>
    %259 = vector.extract_strided_slice %257 {offsets = [0, 0], sizes = [8, 32], strides = [1, 1]} : vector<8x96xf32> to vector<8x32xf32>
    %260 = vector.extract_strided_slice %258 {offsets = [0, 0], sizes = [8, 32], strides = [1, 1]} : vector<8x96xf32> to vector<8x32xf32>
    %261 = arith.addf %259, %260 : vector<8x32xf32>
    %262 = arith.negf %261 : vector<8x32xf32>
    %263 = math.exp %262 : vector<8x32xf32>
    %cst_37 = arith.constant 1.000000e+00 : f32
    %264 = vector.broadcast %cst_37 : f32 to vector<8x32xf32>
    %265 = arith.addf %264, %263 : vector<8x32xf32>
    %266 = arith.divf %264, %265 : vector<8x32xf32>
    %267 = vector.extract_strided_slice %257 {offsets = [0, 32], sizes = [8, 32], strides = [1, 1]} : vector<8x96xf32> to vector<8x32xf32>
    %268 = vector.extract_strided_slice %258 {offsets = [0, 32], sizes = [8, 32], strides = [1, 1]} : vector<8x96xf32> to vector<8x32xf32>
    %269 = arith.addf %267, %268 : vector<8x32xf32>
    %270 = arith.negf %269 : vector<8x32xf32>
    %271 = math.exp %270 : vector<8x32xf32>
    %cst_38 = arith.constant 1.000000e+00 : f32
    %272 = vector.broadcast %cst_38 : f32 to vector<8x32xf32>
    %273 = arith.addf %272, %271 : vector<8x32xf32>
    %274 = arith.divf %272, %273 : vector<8x32xf32>
    %275 = vector.extract_strided_slice %257 {offsets = [0, 64], sizes = [8, 32], strides = [1, 1]} : vector<8x96xf32> to vector<8x32xf32>
    %276 = vector.extract_strided_slice %258 {offsets = [0, 64], sizes = [8, 32], strides = [1, 1]} : vector<8x96xf32> to vector<8x32xf32>
    %277 = vector.broadcast %10 : vector<1x32xf32> to vector<8x32xf32>
    %278 = arith.addf %276, %277 : vector<8x32xf32>
    %279 = arith.mulf %266, %278 : vector<8x32xf32>
    %280 = arith.addf %275, %279 : vector<8x32xf32>
    %281 = math.tanh %280 : vector<8x32xf32>
    %cst_39 = arith.constant 1.000000e+00 : f32
    %282 = vector.broadcast %cst_39 : f32 to vector<8x32xf32>
    %283 = arith.subf %282, %274 : vector<8x32xf32>
    %284 = arith.mulf %283, %281 : vector<8x32xf32>
    %285 = arith.mulf %274, %256 : vector<8x32xf32>
    %286 = arith.addf %284, %285 : vector<8x32xf32>
    %c7_i32 = arith.constant 7 : i32
    %287 = vector.broadcast %c7_i32 : i32 to vector<8x1xi32>
    %288 = arith.cmpi sgt, %8, %287 : vector<8x1xi32>
    %289 = vector.shape_cast %288 : vector<8x1xi1> to vector<8x1xi1>
    %290 = vector.broadcast %289 : vector<8x1xi1> to vector<8x32xi1>
    %291 = arith.select %290, %286, %256 : vector<8x32xi1>, vector<8x32xf32>
    %c0_40 = arith.constant 0 : index
    %c0_41 = arith.constant 0 : index
    %c0_42 = arith.constant 0 : index
    %292 = vector.load %arg1[%c0_40, %c0_41, %c0_42] : memref<8x8x36xf32, #tpu.memory_space<vmem>>, vector<8x8x36xf32>
    %293 = vector.extract_strided_slice %292 {offsets = [0, 0, 0], sizes = [8, 8, 32], strides = [1, 1, 1]} : vector<8x8x36xf32> to vector<8x8x32xf32>
    %294 = vector.shape_cast %293 : vector<8x8x32xf32> to vector<64x32xf32>
    %c104 = arith.constant 104 : index
    %c0_43 = arith.constant 0 : index
    %295 = vector.load %arg2[%c104, %c0_43] : memref<376x128xf32, #tpu.memory_space<vmem>>, vector<32x32xf32>
    %c136 = arith.constant 136 : index
    %c0_44 = arith.constant 0 : index
    %296 = vector.load %arg2[%c136, %c0_44] : memref<376x128xf32, #tpu.memory_space<vmem>>, vector<1x32xf32>
    %cst_45 = arith.constant dense<0.000000e+00> : vector<64x32xf32>
    %297 = tpu.matmul %294, %295, %cst_45 {dimension_numbers = #tpu.dot_dimension_numbers<[1], [0], [0], [1], [0, 0, 1, 1], [], []>} : vector<64x32xf32>, vector<32x32xf32>, vector<64x32xf32> -> vector<64x32xf32>
    %298 = vector.broadcast %296 : vector<1x32xf32> to vector<64x32xf32>
    %299 = arith.addf %297, %298 : vector<64x32xf32>
    %cst_46 = arith.constant 0.000000e+00 : f32
    %300 = vector.broadcast %cst_46 : f32 to vector<64x32xf32>
    %301 = arith.maximumf %299, %300 : vector<64x32xf32>
    %c144 = arith.constant 144 : index
    %c0_47 = arith.constant 0 : index
    %302 = vector.load %arg2[%c144, %c0_47] : memref<376x128xf32, #tpu.memory_space<vmem>>, vector<32x64xf32>
    %c176 = arith.constant 176 : index
    %c0_48 = arith.constant 0 : index
    %303 = vector.load %arg2[%c176, %c0_48] : memref<376x128xf32, #tpu.memory_space<vmem>>, vector<1x64xf32>
    %cst_49 = arith.constant dense<0.000000e+00> : vector<8x64xf32>
    %304 = tpu.matmul %291, %302, %cst_49 {dimension_numbers = #tpu.dot_dimension_numbers<[1], [0], [0], [1], [0, 0, 1, 1], [], []>} : vector<8x32xf32>, vector<32x64xf32>, vector<8x64xf32> -> vector<8x64xf32>
    %305 = vector.broadcast %303 : vector<1x64xf32> to vector<8x64xf32>
    %306 = arith.addf %304, %305 : vector<8x64xf32>
    %307 = vector.extract_strided_slice %306 {offsets = [0, 0], sizes = [8, 32], strides = [1, 1]} : vector<8x64xf32> to vector<8x32xf32>
    %cst_50 = arith.constant 0.000000e+00 : f32
    %308 = vector.broadcast %cst_50 : f32 to vector<8x32xf32>
    %309 = arith.maximumf %307, %308 : vector<8x32xf32>
    %310 = vector.extract_strided_slice %306 {offsets = [0, 32], sizes = [8, 32], strides = [1, 1]} : vector<8x64xf32> to vector<8x32xf32>
    %311 = vector.shape_cast %301 : vector<64x32xf32> to vector<8x8x32xf32>
    %312 = vector.shape_cast %309 : vector<8x32xf32> to vector<8x1x32xf32>
    %313 = vector.broadcast %312 : vector<8x1x32xf32> to vector<8x8x32xf32>
    %314 = arith.mulf %311, %313 : vector<8x8x32xf32>
    %c184 = arith.constant 184 : index
    %c0_51 = arith.constant 0 : index
    %315 = vector.load %arg2[%c184, %c0_51] : memref<376x128xf32, #tpu.memory_space<vmem>>, vector<32x2xf32>
    %c216 = arith.constant 216 : index
    %c0_52 = arith.constant 0 : index
    %316 = vector.load %arg2[%c216, %c0_52] : memref<376x128xf32, #tpu.memory_space<vmem>>, vector<1x2xf32>
    %317 = vector.shape_cast %314 : vector<8x8x32xf32> to vector<64x32xf32>
    %cst_53 = arith.constant dense<0.000000e+00> : vector<64x2xf32>
    %318 = tpu.matmul %317, %315, %cst_53 {dimension_numbers = #tpu.dot_dimension_numbers<[1], [0], [0], [1], [0, 0, 1, 1], [], []>} : vector<64x32xf32>, vector<32x2xf32>, vector<64x2xf32> -> vector<64x2xf32>
    %319 = vector.broadcast %316 : vector<1x2xf32> to vector<64x2xf32>
    %320 = arith.addf %318, %319 : vector<64x2xf32>
    %321 = vector.shape_cast %320 : vector<64x2xf32> to vector<8x8x2xf32>
    %cst_54 = arith.constant dense<0xFF800000> : vector<8x2xf32>
    %322 = vector.multi_reduction <maximumf>, %321, %cst_54 [1] : vector<8x8x2xf32> to vector<8x2xf32>
    %323 = vector.shape_cast %322 : vector<8x2xf32> to vector<8x1x2xf32>
    %324 = vector.broadcast %323 : vector<8x1x2xf32> to vector<8x8x2xf32>
    %325 = arith.subf %321, %324 : vector<8x8x2xf32>
    %326 = math.exp %325 : vector<8x8x2xf32>
    %cst_55 = arith.constant dense<0.000000e+00> : vector<8x2xf32>
    %327 = vector.multi_reduction <add>, %326, %cst_55 [1] : vector<8x8x2xf32> to vector<8x2xf32>
    %328 = vector.shape_cast %327 : vector<8x2xf32> to vector<8x1x2xf32>
    %329 = vector.broadcast %328 : vector<8x1x2xf32> to vector<8x8x2xf32>
    %330 = arith.divf %326, %329 : vector<8x8x2xf32>
    %c0_56 = arith.constant 0 : index
    %c0_57 = arith.constant 0 : index
    %c0_58 = arith.constant 0 : index
    %331 = vector.load %arg4[%c0_56, %c0_57, %c0_58] : memref<8x8x2xf32, #tpu.memory_space<vmem>>, vector<8x8x2xf32>
    tpu.vector_store %arg4[%c0_56, %c0_57, %c0_58], %330 {strides = array<i32>} : memref<8x8x2xf32, #tpu.memory_space<vmem>>, vector<8x8x2xf32>,
    %c224 = arith.constant 224 : index
    %c0_59 = arith.constant 0 : index
    %332 = vector.load %arg2[%c224, %c0_59] : memref<376x128xf32, #tpu.memory_space<vmem>>, vector<64x32xf32>
    %c288 = arith.constant 288 : index
    %c0_60 = arith.constant 0 : index
    %333 = vector.load %arg2[%c288, %c0_60] : memref<376x128xf32, #tpu.memory_space<vmem>>, vector<1x32xf32>
    %334 = vector.extract_strided_slice %330 {offsets = [0, 0, 0], sizes = [8, 8, 1], strides = [1, 1, 1]} : vector<8x8x2xf32> to vector<8x8x1xf32>
    %335 = vector.broadcast %334 : vector<8x8x1xf32> to vector<8x8x32xf32>
    %336 = arith.mulf %335, %293 : vector<8x8x32xf32>
    %cst_61 = arith.constant dense<0.000000e+00> : vector<8x32xf32>
    %337 = vector.multi_reduction <add>, %336, %cst_61 [1] : vector<8x8x32xf32> to vector<8x32xf32>
    %338 = vector.extract_strided_slice %332 {offsets = [0, 0], sizes = [32, 32], strides = [1, 1]} : vector<64x32xf32> to vector<32x32xf32>
    %cst_62 = arith.constant dense<0.000000e+00> : vector<8x32xf32>
    %339 = tpu.matmul %337, %338, %cst_62 {dimension_numbers = #tpu.dot_dimension_numbers<[1], [0], [0], [1], [0, 0, 1, 1], [], []>} : vector<8x32xf32>, vector<32x32xf32>, vector<8x32xf32> -> vector<8x32xf32>
    %340 = vector.broadcast %333 : vector<1x32xf32> to vector<8x32xf32>
    %341 = arith.addf %340, %339 : vector<8x32xf32>
    %342 = vector.extract_strided_slice %330 {offsets = [0, 0, 1], sizes = [8, 8, 1], strides = [1, 1, 1]} : vector<8x8x2xf32> to vector<8x8x1xf32>
    %343 = vector.broadcast %342 : vector<8x8x1xf32> to vector<8x8x32xf32>
    %344 = arith.mulf %343, %293 : vector<8x8x32xf32>
    %cst_63 = arith.constant dense<0.000000e+00> : vector<8x32xf32>
    %345 = vector.multi_reduction <add>, %344, %cst_63 [1] : vector<8x8x32xf32> to vector<8x32xf32>
    %346 = vector.extract_strided_slice %332 {offsets = [32, 0], sizes = [32, 32], strides = [1, 1]} : vector<64x32xf32> to vector<32x32xf32>
    %cst_64 = arith.constant dense<0.000000e+00> : vector<8x32xf32>
    %347 = tpu.matmul %345, %346, %cst_64 {dimension_numbers = #tpu.dot_dimension_numbers<[1], [0], [0], [1], [0, 0, 1, 1], [], []>} : vector<8x32xf32>, vector<32x32xf32>, vector<8x32xf32> -> vector<8x32xf32>
    %348 = arith.addf %341, %347 : vector<8x32xf32>
    %349 = arith.mulf %348, %310 : vector<8x32xf32>
    %c296 = arith.constant 296 : index
    %c0_65 = arith.constant 0 : index
    %350 = vector.load %arg2[%c296, %c0_65] : memref<376x128xf32, #tpu.memory_space<vmem>>, vector<32x32xf32>
    %c328 = arith.constant 328 : index
    %c0_66 = arith.constant 0 : index
    %351 = vector.load %arg2[%c328, %c0_66] : memref<376x128xf32, #tpu.memory_space<vmem>>, vector<1x32xf32>
    %cst_67 = arith.constant dense<0.000000e+00> : vector<8x32xf32>
    %352 = tpu.matmul %349, %350, %cst_67 {dimension_numbers = #tpu.dot_dimension_numbers<[1], [0], [0], [1], [0, 0, 1, 1], [], []>} : vector<8x32xf32>, vector<32x32xf32>, vector<8x32xf32> -> vector<8x32xf32>
    %353 = vector.broadcast %351 : vector<1x32xf32> to vector<8x32xf32>
    %354 = arith.addf %352, %353 : vector<8x32xf32>
    %cst_68 = arith.constant 0.000000e+00 : f32
    %355 = vector.broadcast %cst_68 : f32 to vector<8x32xf32>
    %356 = arith.maximumf %354, %355 : vector<8x32xf32>
    %c336 = arith.constant 336 : index
    %c0_69 = arith.constant 0 : index
    %357 = vector.load %arg2[%c336, %c0_69] : memref<376x128xf32, #tpu.memory_space<vmem>>, vector<32x16xf32>
    %c368 = arith.constant 368 : index
    %c0_70 = arith.constant 0 : index
    %358 = vector.load %arg2[%c368, %c0_70] : memref<376x128xf32, #tpu.memory_space<vmem>>, vector<1x16xf32>
    %cst_71 = arith.constant dense<0.000000e+00> : vector<8x16xf32>
    %359 = tpu.matmul %356, %357, %cst_71 {dimension_numbers = #tpu.dot_dimension_numbers<[1], [0], [0], [1], [0, 0, 1, 1], [], []>} : vector<8x32xf32>, vector<32x16xf32>, vector<8x16xf32> -> vector<8x16xf32>
    %360 = vector.broadcast %358 : vector<1x16xf32> to vector<8x16xf32>
    %361 = arith.addf %359, %360 : vector<8x16xf32>
    %c0_72 = arith.constant 0 : index
    %c0_73 = arith.constant 0 : index
    %362 = vector.load %arg3[%c0_72, %c0_73] : memref<8x16xf32, #tpu.memory_space<vmem>>, vector<8x16xf32>
    tpu.vector_store %arg3[%c0_72, %c0_73], %361 {strides = array<i32>} : memref<8x16xf32, #tpu.memory_space<vmem>>, vector<8x16xf32>,
    return
  }
}

</mosaic_0001>

<bundles_post_ra>
// kernel: net_forward.1
= control target key start
LH: loop header
LB: loop body
LE: loop exit
PB: predicated region body
PF: predicated region fallthrough
CT: control target
= control target key end

     0   :  { %10 = vsyncpa [#allocation3], 0  ;;  %s1769_s18 = smov [#allocation2]   ;;  %s1770_s20 = smov 128   ;;  %s2250_s0 = inlined_call_operand.vmem [shape: s32[72,1], index: 0, kind: input, shape index: {}]   ;;  %s2251_s1 = inlined_call_operand.vmem [shape: f32[8,8,36], index: 1, kind: input, shape index: {}]   ;;  %s2252_s2 = inlined_call_operand.hbm [shape: f32[376,128], index: 2, kind: input, shape index: {}]   ;;  %s2253_s3 = inlined_call_operand.vmem [shape: f32[8,16], index: 3, kind: output, shape index: {0}]   ;;  %s2254_s4 = inlined_call_operand.vmem [shape: f32[8,8,2], index: 4, kind: output, shape index: {1}]  }
   0x1   :  { %s19_s17 = sshll.u32 %s2252_s2, 4  ;;  %s21_s19 = sshll.u32 %s1769_s18, 4  ;;  %s20_s17 = int_to_ptr.hbm [resolvable:$true] %s19_s17  ;;  %s22_s19 = int_to_ptr.vmem [resolvable:$true] %s21_s19 }
   0x2   :  { %s1771_s21 = smov 8  }
   0x3   :  { %27 = dma.hbm_to_vmem [thread:$0]  %s20_s17, 6016, %s22_s19, [#allocation3], %s1770_s20, %s1770_s20, %s1771_s21  }
   0x4   :  { %1767 = dma.done.wait [#allocation3], 6016  }
   0x5   :  { %1768 = vsyncadd [#allocation3], 4294961280  ;;  %v1772_v0 = vmov 0   ;;  %v32_v1 = vld [vmem:[%s2250_s0] sm:$0xff]  ;;  %v97_v2 = vld [vmem:[#allocation2 + $0x38] sm:$0xff]  ;;  %v40_v10 = vlaneseq  ;;  %vm98_vm0 = vcmask 523264  }
   0x6   :  { %1638 = vset.pattern.permute.xlu0 %v1772_v0  ;;  %1639 = vset.pattern.permute.xlu1 %v1772_v0  ;;  %v96_v3 = vld [vmem:[#allocation2 + $0x30] sm:$0xff]  ;;  %v95_v4 = vld [vmem:[#allocation2 + $0x28] sm:$0xff]  ;;  %v94_v5 = vld [vmem:[#allocation2 + $0x20] sm:$0xff]  ;;  %v1773_v13 = vmov 0.0   ;;  %s1774_s2 = smov 64   ;;  %s1775_s26 = smov 96  }
   0x7   :  { %1640 = vset.pattern.permute.xlu2 %v1772_v0  ;;  %43 = vperm.xlu0 %1638, %v32_v1   ;;  %v93_v6 = vld [vmem:[#allocation2 + $0x18] sm:$0xff]  ;;  %v92_v7 = vld [vmem:[#allocation2 + $0x10] sm:$0xff]  ;;  %v91_v8 = vld [vmem:[#allocation2 + $0x8] sm:$0xff]  ;;  %v1811_v11 = vand.u32 127, %v40_v10  ;;  %vm217_vm8 = vcmask 261120  }
   0x8   :  { %131 = vmatpush.msra.mxu0 %v97_v2  ;;  %v90_v9 = vld [vmem:[#allocation2] sm:$0xff]  ;;  %v1826_v36 = vld [vmem:[#allocation2 + $0x58] sm:$0xff]  ;;  %v1828_v37 = vld [vmem:[#allocation2 + $0x50] sm:$0xff] }
   0x9   :  { %v1654_v26 = vld [vmem:[#allocation2 + $0x60] ss:$0 sm:$0xff]  ;;  %232 = vmatpush.msra.mxu3 %v1826_v36  ;;  %308 = vmatpush.msra.mxu2 %v1826_v36  ;;  %v1832_v38 = vld [vmem:[#allocation2 + $0x48] sm:$0xff] }
   0xa   :  { %132 = vmatpush.msra.mxu0 %v96_v3  ;;  %v1821_v34 = vld [vmem:[%s2250_s0 + $0x40] sm:$0xff]  ;;  %668 = vmatpush.msra.mxu1 %v1826_v36  ;;  %v33_v47 = vld [vmem:[%s2250_s0 + $0x8] sm:$0xff] }
   0xb   :  { %vm207_vm6 = vcmp.gt.s32.totalorder %v1821_v34, 0  ;;  %233 = vmatpush.msra.mxu3 %v1828_v37  ;;  %309 = vmatpush.msra.mxu2 %v1828_v37  ;;  %v1837_v39 = vld [vmem:[#allocation2 + $0x40] sm:$0xff]  ;;  %vm284_vm10 = vcmp.gt.s32.totalorder %v1821_v34, 1 }
   0xc   :  { %133 = vmatpush.msra.mxu0 %v95_v4  ;;  %v208_v35 = vsel %vm207_vm6, 1, %v1772_v0  ;;  %669 = vmatpush.msra.mxu1 %v1828_v37  ;;  %v285_v54 = vsel %vm284_vm10, 1, %v1772_v0  ;;  %vm428_vm10 = vcmp.gt.s32.totalorder %v1821_v34, 3 }
   0xd   :  { %234 = vmatpush.msra.mxu3 %v1832_v38  ;;  %310 = vmatpush.msra.mxu2 %v1832_v38 }
   0xe   :  { %134 = vmatpush.msra.mxu0 %v94_v5  ;;  %670 = vmatpush.msra.mxu1 %v1832_v38 }
   0xf   :  { %235 = vmatpush.msra.mxu3 %v1837_v39  ;;  %311 = vmatpush.msra.mxu2 %v1837_v39 }
  0x10   :  { %135 = vmatpush.msra.mxu0 %v93_v6  ;;  %671 = vmatpush.msra.mxu1 %v1837_v39 }
  0x11   :  { %380 = vmatpush.msrb.mxu3 %v1826_v36  ;;  %524 = vmatpush.msrb.mxu2 %v1826_v36 }
  0x12   :  { %136 = vmatpush.msra.mxu0 %v92_v7 }
  0x13   :  { %381 = vmatpush.msrb.mxu3 %v1828_v37  ;;  %525 = vmatpush.msrb.mxu2 %v1828_v37 }
  0x14   :  { %137 = vmatpush.msra.mxu0 %v91_v8 }
  0x15   :  { %382 = vmatpush.msrb.mxu3 %v1832_v38  ;;  %526 = vmatpush.msrb.mxu2 %v1832_v38 }
  0x16   :  { %138 = vmatpush.msra.mxu0 %v90_v9 }
  0x17   :  { %383 = vmatpush.msrb.mxu3 %v1837_v39  ;;  %527 = vmatpush.msrb.mxu2 %v1837_v39 }
  0x79   :  { %v44_v12 = vpop.permute.xlu0 %43 }
  0x7a   :  { %vm66_vm1 = vcmp.eq.s32.totalorder %v1811_v11, %v44_v12 }
  0x7b   :  { %v1578_v14 = vsel %vm66_vm1, 1.0, %v1773_v13 }
  0x7c   :  { %1586 = vmatmul.msk.f32.vlgmr.msra.gmra.mxu0 %vm98_vm0, %v1578_v14  ;;  %v34_v14 = vld [vmem:[%s2250_s0 + $0x10] sm:$0xff] }
  0xf9   :  { %v140_v15 = vpop.f32.mrf.mxu0 }
  0xfa   :  { %v1594_v16 = vmul.f32 -1.442695, %v140_v15 }
  0xfc   :  { %1661 = vpow2.f32 %v1594_v16 }
 0x102   :  { %v1662_v17 = vpop.eup %1661 }
 0x103   :  { %v174_v18 = vadd.f32 1.0, %v1662_v17 }
 0x105   :  { %1663 = vrcp.f32 %v174_v18  ;;  %v186_v22 = vand.u32 2147483648, %v174_v18  ;;  %v184_v24 = vand.u32 2147483647, %v174_v18  ;;  %vm180_vm3 = vweird.f32 %v174_v18 }
 0x107   :  { %v187_v27 = vor.u32 1.1754944e-38, %v186_v22  ;;  %vm185_vm5 = vcmp.eq.f32.partialorder %v184_v24, 8.507059e+37 }
 0x10b   :  { %v1664_v19 = vpop.eup %1663 }
 0x10c   :  { %v176_v20 = vmul.f32 %v1664_v19, %v174_v18  ;;  %vm181_vm2 = vweird.f32 %v1664_v19 }
 0x10d   :  { %vm182_vm4 = vmor %vm180_vm3, %vm181_vm2  ;;  %vm356_vm2 = vcmp.gt.s32.totalorder %v1821_v34, 2 }
 0x10e   :  { %v177_v21 = vsub.f32 1.0, %v176_v20 }
 0x110   :  { %v178_v23 = vmul.f32 %v1664_v19, %v177_v21 }
 0x112   :  { %v179_v25 = vadd.f32 %v1664_v19, %v178_v23 }
 0x114   :  { %v183_v28 = vsel %vm182_vm4, %v1664_v19, %v179_v25 }
 0x115   :  { %v188_v29 = vsel %vm185_vm5, %v187_v27, %v183_v28  ;;  %v357_v27 = vsel %vm356_vm2, 1, %v1772_v0  ;;  %vm500_vm2 = vcmp.gt.s32.totalorder %v1821_v34, 4 }
 0x116   :  { %v192_v30 = vmul.f32 %v1654_v26, %v188_v29  ;;  %v199_v41 = vsub.f32 1.0, %v188_v29  ;;  %v205_v43 = vmul.f32 0.0, %v188_v29 }
 0x118   :  { %194 = vrot.lane.b32.xlu0 %v192_v30, %s1774_s2 }
 0x120   :  { %261 = vrot.lane.b32.xlu0 %v1654_v26, %s1774_s2 }
 0x18a   :  { %v195_v31 = vpop.permute.xlu0 %194 }
 0x18b   :  { %v197_v32 = vadd.f32 %v195_v31, %v140_v15 }
 0x18d   :  { %1665 = vtanh.f32 %v197_v32 }
 0x192   :  { %v1866_v51 = vpop.permute.xlu0 %261 }
 0x193   :  { %v1666_v33 = vpop.eup %1665 }
 0x194   :  { %201 = vrot.lane.b32.xlu1 %v1666_v33, %s1775_s26 }
 0x19c   :  { %210 = vperm.xlu1 %1639, %v208_v35  }
 0x206   :  { %v202_v40 = vpop.permute.xlu1 %201 }
 0x207   :  { %v204_v42 = vmul.f32 %v202_v40, %v199_v41 }
 0x209   :  { %v206_v44 = vadd.f32 %v205_v43, %v204_v42 }
 0x20e   :  { %v211_v45 = vpop.permute.xlu1 %210 }
 0x20f   :  { %vm212_vm7 = vcmp.eq.s32.totalorder %v211_v45, 1 }
 0x210   :  { %v213_v46 = vsel %vm212_vm7, %v206_v44, 0.0 }
 0x211   :  { %215 = vrot.lane.b32.xlu2 %v213_v46, %s1775_s26 }
 0x219   :  { %46 = vperm.xlu2 %1640, %v33_v47  }
 0x26b   :  { %v216_v48 = vpop.permute.xlu2 %215 }
 0x26c   :  { %1595 = vmatmul.msk.f32.vlgmr.msra.gmra.mxu3 %vm217_vm8, %v216_v48 }
 0x26d   :  { %452 = vmatpush.msra.mxu3 %v1826_v36 }
 0x26f   :  { %453 = vmatpush.msra.mxu3 %v1828_v37 }
 0x271   :  { %454 = vmatpush.msra.mxu3 %v1832_v38 }
 0x273   :  { %v47_v49 = vpop.permute.xlu2 %46  ;;  %455 = vmatpush.msra.mxu3 %v1837_v39 }
 0x274   :  { %vm67_vm9 = vcmp.eq.s32.totalorder %v1811_v11, %v47_v49 }
 0x275   :  { %v1579_v50 = vsel %vm67_vm9, 1.0, %v1773_v13 }
 0x276   :  { %1587 = vmatmul.msk.f32.gmra.mxu0 %vm98_vm0, %v1579_v50 }
 0x2ef   :  { %v237_v52 = vpop.f32.mrf.mxu3 }
 0x2f0   :  { %v264_v53 = vadd.f32 %v1866_v51, %v237_v52 }
 0x2f2   :  { %266 = vrot.lane.b32.xlu1 %v264_v53, %s1774_s2 }
 0x2f3   :  { %v143_v55 = vpop.f32.mrf.mxu0 }
 0x2f4   :  { %v240_v56 = vadd.f32 %v237_v52, %v143_v55 }
 0x2f6   :  { %v1596_v57 = vmul.f32 -1.442695, %v240_v56 }
 0x2f8   :  { %1667 = vpow2.f32 %v1596_v57 }
 0x2fa   :  { %287 = vperm.xlu1 %1639, %v285_v54   ;;  %v35_v54 = vld [vmem:[%s2250_s0 + $0x18] sm:$0xff] }
 0x2fe   :  { %v1668_v58 = vpop.eup %1667 }
 0x2ff   :  { %v244_v59 = vadd.f32 1.0, %v1668_v58 }
 0x301   :  { %1669 = vrcp.f32 %v244_v59  ;;  %v256_v2 = vand.u32 2147483648, %v244_v59  ;;  %vm250_vm12 = vweird.f32 %v244_v59  ;;  %v254_v3 = vand.u32 2147483647, %v244_v59 }
 0x303   :  { %v257_v5 = vor.u32 1.1754944e-38, %v256_v2  ;;  %vm255_vm14 = vcmp.eq.f32.partialorder %v254_v3, 8.507059e+37 }
 0x307   :  { %v1670_v60 = vpop.eup %1669 }
 0x308   :  { %v246_v61 = vmul.f32 %v1670_v60, %v244_v59  ;;  %vm251_vm11 = vweird.f32 %v1670_v60 }
 0x309   :  { %vm252_vm13 = vmor %vm250_vm12, %vm251_vm11 }
 0x30a   :  { %v247_v62 = vsub.f32 1.0, %v246_v61 }
 0x30c   :  { %v248_v63 = vmul.f32 %v1670_v60, %v247_v62 }
 0x30e   :  { %v249_v1 = vadd.f32 %v1670_v60, %v248_v63 }
 0x310   :  { %v253_v4 = vsel %vm252_vm13, %v1670_v60, %v249_v1 }
 0x311   :  { %v258_v6 = vsel %vm255_vm14, %v257_v5, %v253_v4  ;;  %v429_v4 = vsel %vm428_vm10, 1, %v1772_v0  ;;  %vm572_vm10 = vcmp.gt.s32.totalorder %v1821_v34, 5 }
 0x312   :  { %v276_v15 = vsub.f32 1.0, %v258_v6  ;;  %v282_v18 = vmul.f32 %v258_v6, %v213_v46 }
 0x364   :  { %v267_v7 = vpop.permute.xlu1 %266 }
 0x365   :  { %v269_v8 = vmul.f32 %v267_v7, %v258_v6 }
 0x367   :  { %271 = vrot.lane.b32.xlu2 %v269_v8, %s1774_s2 }
 0x36c   :  { %v288_v17 = vpop.permute.xlu1 %287 }
 0x36d   :  { %vm289_vm15 = vcmp.eq.s32.totalorder %v288_v17, 1 }
 0x3c1   :  { %v272_v9 = vpop.permute.xlu2 %271 }
 0x3c2   :  { %v274_v10 = vadd.f32 %v272_v9, %v143_v55 }
 0x3c4   :  { %1671 = vtanh.f32 %v274_v10 }
 0x3ca   :  { %v1672_v12 = vpop.eup %1671 }
 0x3cb   :  { %278 = vrot.lane.b32.xlu0 %v1672_v12, %s1775_s26 }
 0x3d3   :  { %49 = vperm.xlu0 %1638, %v34_v14  }
 0x43d   :  { %v279_v16 = vpop.permute.xlu0 %278 }
 0x43e   :  { %v281_v19 = vmul.f32 %v279_v16, %v276_v15 }
 0x440   :  { %v283_v20 = vadd.f32 %v282_v18, %v281_v19 }
 0x442   :  { %v290_v21 = vsel %vm289_vm15, %v283_v20, %v213_v46 }
 0x443   :  { %292 = vrot.lane.b32.xlu2 %v290_v21, %s1775_s26 }
 0x445   :  { %v50_v22 = vpop.permute.xlu0 %49 }
 0x446   :  { %vm68_vm1 = vcmp.eq.s32.totalorder %v1811_v11, %v50_v22 }
 0x447   :  { %v1580_v23 = vsel %vm68_vm1, 1.0, %v1773_v13 }
 0x448   :  { %1588 = vmatmul.msk.f32.gmra.mxu0 %vm98_vm0, %v1580_v23  ;;  %v36_v23 = vld [vmem:[%s2250_s0 + $0x20] sm:$0xff] }
 0x49d   :  { %v293_v24 = vpop.permute.xlu2 %292 }
 0x49e   :  { %1597 = vmatmul.msk.f32.vlgmr.msra.gmra.mxu2 %vm217_vm8, %v293_v24 }
 0x4c5   :  { %v146_v28 = vpop.f32.mrf.mxu0 }
 0x521   :  { %v313_v25 = vpop.f32.mrf.mxu2 }
 0x522   :  { %v336_v26 = vadd.f32 %v313_v25, %v1866_v51  ;;  %v316_v29 = vadd.f32 %v313_v25, %v146_v28 }
 0x524   :  { %338 = vrot.lane.b32.xlu1 %v336_v26, %s1774_s2  ;;  %v1598_v30 = vmul.f32 -1.442695, %v316_v29 }
 0x526   :  { %1673 = vpow2.f32 %v1598_v30 }
 0x52c   :  { %359 = vperm.xlu1 %1639, %v357_v27   ;;  %v1674_v31 = vpop.eup %1673 }
 0x52d   :  { %v320_v32 = vadd.f32 1.0, %v1674_v31 }
 0x52f   :  { %1675 = vrcp.f32 %v320_v32  ;;  %v332_v43 = vand.u32 2147483648, %v320_v32  ;;  %vm326_vm4 = vweird.f32 %v320_v32  ;;  %v330_v44 = vand.u32 2147483647, %v320_v32 }
 0x531   :  { %v333_v46 = vor.u32 1.1754944e-38, %v332_v43  ;;  %vm331_vm6 = vcmp.eq.f32.partialorder %v330_v44, 8.507059e+37 }
 0x535   :  { %v1676_v33 = vpop.eup %1675 }
 0x536   :  { %v322_v35 = vmul.f32 %v1676_v33, %v320_v32  ;;  %vm327_vm3 = vweird.f32 %v1676_v33 }
 0x537   :  { %vm328_vm5 = vmor %vm326_vm4, %vm327_vm3 }
 0x538   :  { %v323_v40 = vsub.f32 1.0, %v322_v35 }
 0x53a   :  { %v324_v41 = vmul.f32 %v1676_v33, %v323_v40 }
 0x53c   :  { %v325_v42 = vadd.f32 %v1676_v33, %v324_v41  ;;  %v501_v41 = vsel %vm500_vm2, 1, %v1772_v0  ;;  %vm644_vm2 = vcmp.gt.s32.totalorder %v1821_v34, 6 }
 0x53e   :  { %v329_v45 = vsel %vm328_vm5, %v1676_v33, %v325_v42 }
 0x53f   :  { %v334_v48 = vsel %vm331_vm6, %v333_v46, %v329_v45 }
 0x540   :  { %v348_v55 = vsub.f32 1.0, %v334_v48  ;;  %v354_v58 = vmul.f32 %v334_v48, %v290_v21 }
 0x596   :  { %v339_v47 = vpop.permute.xlu1 %338 }
 0x597   :  { %v341_v49 = vmul.f32 %v339_v47, %v334_v48 }
 0x599   :  { %343 = vrot.lane.b32.xlu2 %v341_v49, %s1774_s2 }
 0x59e   :  { %v360_v57 = vpop.permute.xlu1 %359 }
 0x59f   :  { %vm361_vm7 = vcmp.eq.s32.totalorder %v360_v57, 1 }
 0x5f3   :  { %v344_v50 = vpop.permute.xlu2 %343 }
 0x5f4   :  { %v346_v52 = vadd.f32 %v344_v50, %v146_v28 }
 0x5f6   :  { %1677 = vtanh.f32 %v346_v52 }
 0x5fc   :  { %v1678_v53 = vpop.eup %1677 }
 0x5fd   :  { %350 = vrot.lane.b32.xlu0 %v1678_v53, %s1775_s26 }
 0x605   :  { %52 = vperm.xlu0 %1638, %v35_v54  }
 0x66f   :  { %v351_v56 = vpop.permute.xlu0 %350 }
 0x670   :  { %v353_v59 = vmul.f32 %v351_v56, %v348_v55 }
 0x672   :  { %v355_v60 = vadd.f32 %v354_v58, %v353_v59 }
 0x674   :  { %v362_v61 = vsel %vm361_vm7, %v355_v60, %v290_v21 }
 0x675   :  { %364 = vrot.lane.b32.xlu2 %v362_v61, %s1775_s26 }
 0x677   :  { %v53_v62 = vpop.permute.xlu0 %52 }
 0x678   :  { %vm69_vm9 = vcmp.eq.s32.totalorder %v1811_v11, %v53_v62 }
 0x679   :  { %v1581_v63 = vsel %vm69_vm9, 1.0, %v1773_v13 }
 0x67a   :  { %1589 = vmatmul.msk.f32.gmra.mxu0 %vm98_vm0, %v1581_v63  ;;  %v37_v63 = vld [vmem:[%s2250_s0 + $0x28] sm:$0xff] }
 0x6cf   :  { %v365_v1 = vpop.permute.xlu2 %364 }
 0x6d0   :  { %1599 = vmatmul.msk.f32.vlgmr.msrb.gmra.mxu3 %vm217_vm8, %v365_v1 }
 0x6d1   :  { %596 = vmatpush.msrb.mxu3 %v1826_v36 }
 0x6d3   :  { %597 = vmatpush.msrb.mxu3 %v1828_v37 }
 0x6d5   :  { %598 = vmatpush.msrb.mxu3 %v1832_v38 }
 0x6d7   :  { %599 = vmatpush.msrb.mxu3 %v1837_v39 }
 0x6f7   :  { %v149_v5 = vpop.f32.mrf.mxu0 }
 0x753   :  { %v385_v2 = vpop.f32.mrf.mxu3 }
 0x754   :  { %v408_v3 = vadd.f32 %v385_v2, %v1866_v51  ;;  %v388_v6 = vadd.f32 %v385_v2, %v149_v5 }
 0x756   :  { %410 = vrot.lane.b32.xlu1 %v408_v3, %s1774_s2  ;;  %v1600_v7 = vmul.f32 -1.442695, %v388_v6 }
 0x758   :  { %1679 = vpow2.f32 %v1600_v7 }
 0x75e   :  { %431 = vperm.xlu1 %1639, %v429_v4   ;;  %v1680_v36 = vpop.eup %1679 }
 0x75f   :  { %v392_v37 = vadd.f32 1.0, %v1680_v36 }
 0x761   :  { %1681 = vrcp.f32 %v392_v37  ;;  %v404_v12 = vand.u32 2147483648, %v392_v37  ;;  %vm398_vm12 = vweird.f32 %v392_v37  ;;  %v402_v14 = vand.u32 2147483647, %v392_v37 }
 0x763   :  { %v405_v16 = vor.u32 1.1754944e-38, %v404_v12  ;;  %vm403_vm14 = vcmp.eq.f32.partialorder %v402_v14, 8.507059e+37 }
 0x767   :  { %v1682_v38 = vpop.eup %1681 }
 0x768   :  { %v394_v8 = vmul.f32 %v1682_v38, %v392_v37  ;;  %vm399_vm11 = vweird.f32 %v1682_v38 }
 0x769   :  { %vm400_vm13 = vmor %vm398_vm12, %vm399_vm11 }
 0x76a   :  { %v395_v39 = vsub.f32 1.0, %v394_v8 }
 0x76c   :  { %v396_v9 = vmul.f32 %v1682_v38, %v395_v39 }
 0x76e   :  { %v397_v10 = vadd.f32 %v1682_v38, %v396_v9  ;;  %v573_v9 = vsel %vm572_vm10, 1, %v1772_v0  ;;  %vm716_vm10 = vcmp.gt.s32.totalorder %v1821_v34, 7 }
 0x770   :  { %v401_v15 = vsel %vm400_vm13, %v1682_v38, %v397_v10 }
 0x771   :  { %v406_v18 = vsel %vm403_vm14, %v405_v16, %v401_v15 }
 0x772   :  { %v420_v24 = vsub.f32 1.0, %v406_v18  ;;  %v426_v27 = vmul.f32 %v406_v18, %v362_v61 }
 0x7c8   :  { %v411_v17 = vpop.permute.xlu1 %410 }
 0x7c9   :  { %v413_v19 = vmul.f32 %v411_v17, %v406_v18 }
 0x7cb   :  { %415 = vrot.lane.b32.xlu2 %v413_v19, %s1774_s2 }
 0x7d0   :  { %v432_v26 = vpop.permute.xlu1 %431 }
 0x7d1   :  { %vm433_vm15 = vcmp.eq.s32.totalorder %v432_v26, 1 }
 0x825   :  { %v416_v20 = vpop.permute.xlu2 %415 }
 0x826   :  { %v418_v21 = vadd.f32 %v416_v20, %v149_v5 }
 0x828   :  { %1683 = vtanh.f32 %v418_v21 }
 0x82e   :  { %v1684_v22 = vpop.eup %1683 }
 0x82f   :  { %422 = vrot.lane.b32.xlu0 %v1684_v22, %s1775_s26 }
 0x837   :  { %55 = vperm.xlu0 %1638, %v36_v23  }
 0x8a1   :  { %v423_v25 = vpop.permute.xlu0 %422 }
 0x8a2   :  { %v425_v28 = vmul.f32 %v423_v25, %v420_v24 }
 0x8a4   :  { %v427_v29 = vadd.f32 %v426_v27, %v425_v28 }
 0x8a6   :  { %v434_v30 = vsel %vm433_vm15, %v427_v29, %v362_v61 }
 0x8a7   :  { %436 = vrot.lane.b32.xlu2 %v434_v30, %s1775_s26 }
 0x8a9   :  { %v56_v31 = vpop.permute.xlu0 %55 }
 0x8aa   :  { %vm70_vm1 = vcmp.eq.s32.totalorder %v1811_v11, %v56_v31 }
 0x8ab   :  { %v1582_v32 = vsel %vm70_vm1, 1.0, %v1773_v13 }
 0x8ac   :  { %1590 = vmatmul.msk.f32.gmra.mxu0 %vm98_vm0, %v1582_v32  ;;  %v38_v32 = vld [vmem:[%s2250_s0 + $0x30] sm:$0xff] }
 0x901   :  { %v437_v33 = vpop.permute.xlu2 %436 }
 0x902   :  { %1601 = vmatmul.msk.f32.vlgmr.msra.gmra.mxu3 %vm217_vm8, %v437_v33 }
 0x929   :  { %v152_v42 = vpop.f32.mrf.mxu0 }
 0x985   :  { %v457_v35 = vpop.f32.mrf.mxu3 }
 0x986   :  { %v480_v40 = vadd.f32 %v457_v35, %v1866_v51  ;;  %v460_v43 = vadd.f32 %v457_v35, %v152_v42 }
 0x988   :  { %482 = vrot.lane.b32.xlu1 %v480_v40, %s1774_s2  ;;  %v1602_v44 = vmul.f32 -1.442695, %v460_v43 }
 0x98a   :  { %1685 = vpow2.f32 %v1602_v44 }
 0x990   :  { %503 = vperm.xlu1 %1639, %v501_v41   ;;  %v1686_v45 = vpop.eup %1685 }
 0x991   :  { %v464_v46 = vadd.f32 1.0, %v1686_v45 }
 0x993   :  { %1687 = vrcp.f32 %v464_v46  ;;  %v476_v53 = vand.u32 2147483648, %v464_v46  ;;  %vm470_vm4 = vweird.f32 %v464_v46  ;;  %v474_v54 = vand.u32 2147483647, %v464_v46 }
 0x995   :  { %v477_v56 = vor.u32 1.1754944e-38, %v476_v53  ;;  %vm475_vm6 = vcmp.eq.f32.partialorder %v474_v54, 8.507059e+37 }
 0x999   :  { %v1688_v47 = vpop.eup %1687 }
 0x99a   :  { %v466_v48 = vmul.f32 %v1688_v47, %v464_v46  ;;  %vm471_vm3 = vweird.f32 %v1688_v47 }
 0x99b   :  { %vm472_vm5 = vmor %vm470_vm4, %vm471_vm3 }
 0x99c   :  { %v467_v49 = vsub.f32 1.0, %v466_v48 }
 0x99e   :  { %v468_v50 = vmul.f32 %v1688_v47, %v467_v49 }
 0x9a0   :  { %v469_v52 = vadd.f32 %v1688_v47, %v468_v50  ;;  %v645_v50 = vsel %vm644_vm2, 1, %v1772_v0 }
 0x9a2   :  { %v473_v55 = vsel %vm472_vm5, %v1688_v47, %v469_v52 }
 0x9a3   :  { %v478_v58 = vsel %vm475_vm6, %v477_v56, %v473_v55 }
 0x9a4   :  { %v492_v1 = vsub.f32 1.0, %v478_v58  ;;  %v498_v4 = vmul.f32 %v478_v58, %v434_v30 }
 0x9fa   :  { %v483_v57 = vpop.permute.xlu1 %482 }
 0x9fb   :  { %v485_v59 = vmul.f32 %v483_v57, %v478_v58 }
 0x9fd   :  { %487 = vrot.lane.b32.xlu2 %v485_v59, %s1774_s2 }
 0xa02   :  { %v504_v3 = vpop.permute.xlu1 %503 }
 0xa03   :  { %vm505_vm7 = vcmp.eq.s32.totalorder %v504_v3, 1 }
 0xa57   :  { %v488_v60 = vpop.permute.xlu2 %487 }
 0xa58   :  { %v490_v61 = vadd.f32 %v488_v60, %v152_v42 }
 0xa5a   :  { %1689 = vtanh.f32 %v490_v61 }
 0xa60   :  { %v1690_v62 = vpop.eup %1689 }
 0xa61   :  { %494 = vrot.lane.b32.xlu0 %v1690_v62, %s1775_s26 }
 0xa69   :  { %58 = vperm.xlu0 %1638, %v37_v63  }
 0xad3   :  { %v495_v2 = vpop.permute.xlu0 %494 }
 0xad4   :  { %v497_v5 = vmul.f32 %v495_v2, %v492_v1 }
 0xad6   :  { %v499_v6 = vadd.f32 %v498_v4, %v497_v5 }
 0xad8   :  { %v506_v7 = vsel %vm505_vm7, %v499_v6, %v434_v30 }
 0xad9   :  { %508 = vrot.lane.b32.xlu2 %v506_v7, %s1775_s26 }
 0xadb   :  { %v59_v36 = vpop.permute.xlu0 %58 }
 0xadc   :  { %vm71_vm9 = vcmp.eq.s32.totalorder %v1811_v11, %v59_v36 }
 0xadd   :  { %v1583_v37 = vsel %vm71_vm9, 1.0, %v1773_v13 }
 0xade   :  { %1591 = vmatmul.msk.f32.gmra.mxu0 %vm98_vm0, %v1583_v37  ;;  %v39_v37 = vld [vmem:[%s2250_s0 + $0x38] sm:$0xff] }
 0xb33   :  { %v509_v38 = vpop.permute.xlu2 %508 }
 0xb34   :  { %1603 = vmatmul.msk.f32.vlgmr.msrb.gmra.mxu2 %vm217_vm8, %v509_v38 }
 0xb5b   :  { %v155_v10 = vpop.f32.mrf.mxu0 }
 0xbb7   :  { %v529_v8 = vpop.f32.mrf.mxu2 }
 0xbb8   :  { %v552_v39 = vadd.f32 %v529_v8, %v1866_v51  ;;  %v532_v12 = vadd.f32 %v529_v8, %v155_v10 }
 0xbba   :  { %554 = vrot.lane.b32.xlu1 %v552_v39, %s1774_s2  ;;  %v1604_v14 = vmul.f32 -1.442695, %v532_v12 }
 0xbbc   :  { %1691 = vpow2.f32 %v1604_v14 }
 0xbc2   :  { %575 = vperm.xlu1 %1639, %v573_v9   ;;  %v1692_v15 = vpop.eup %1691 }
 0xbc3   :  { %v536_v16 = vadd.f32 1.0, %v1692_v15 }
 0xbc5   :  { %1693 = vrcp.f32 %v536_v16  ;;  %v548_v22 = vand.u32 2147483648, %v536_v16  ;;  %vm542_vm12 = vweird.f32 %v536_v16  ;;  %v546_v23 = vand.u32 2147483647, %v536_v16 }
 0xbc7   :  { %v549_v25 = vor.u32 1.1754944e-38, %v548_v22  ;;  %vm547_vm14 = vcmp.eq.f32.partialorder %v546_v23, 8.507059e+37 }
 0xbcb   :  { %v1694_v17 = vpop.eup %1693 }
 0xbcc   :  { %v538_v18 = vmul.f32 %v1694_v17, %v536_v16  ;;  %vm543_vm11 = vweird.f32 %v1694_v17 }
 0xbcd   :  { %vm544_vm13 = vmor %vm542_vm12, %vm543_vm11 }
 0xbce   :  { %v539_v19 = vsub.f32 1.0, %v538_v18 }
 0xbd0   :  { %v540_v20 = vmul.f32 %v1694_v17, %v539_v19 }
 0xbd2   :  { %v541_v21 = vadd.f32 %v1694_v17, %v540_v20  ;;  %v717_v20 = vsel %vm716_vm10, 1, %v1772_v0 }
 0xbd4   :  { %v545_v24 = vsel %vm544_vm13, %v1694_v17, %v541_v21 }
 0xbd5   :  { %v550_v27 = vsel %vm547_vm14, %v549_v25, %v545_v24 }
 0xbd6   :  { %v564_v33 = vsub.f32 1.0, %v550_v27  ;;  %v570_v41 = vmul.f32 %v550_v27, %v506_v7 }
 0xc2c   :  { %v555_v26 = vpop.permute.xlu1 %554 }
 0xc2d   :  { %v557_v28 = vmul.f32 %v555_v26, %v550_v27 }
 0xc2f   :  { %559 = vrot.lane.b32.xlu2 %v557_v28, %s1774_s2 }
 0xc34   :  { %v576_v40 = vpop.permute.xlu1 %575 }
 0xc35   :  { %vm577_vm15 = vcmp.eq.s32.totalorder %v576_v40, 1 }
 0xc89   :  { %v560_v29 = vpop.permute.xlu2 %559 }
 0xc8a   :  { %v562_v30 = vadd.f32 %v560_v29, %v155_v10 }
 0xc8c   :  { %1695 = vtanh.f32 %v562_v30 }
 0xc92   :  { %v1696_v31 = vpop.eup %1695 }
 0xc93   :  { %566 = vrot.lane.b32.xlu0 %v1696_v31, %s1775_s26 }
 0xc9b   :  { %61 = vperm.xlu0 %1638, %v38_v32  }
 0xd05   :  { %v567_v35 = vpop.permute.xlu0 %566 }
 0xd06   :  { %v569_v42 = vmul.f32 %v567_v35, %v564_v33 }
 0xd08   :  { %v571_v43 = vadd.f32 %v570_v41, %v569_v42  ;;  %v734_v42 = vld [vmem:[#allocation2 + $0x80] sm:$0xff] }
 0xd09   :  { %773 = vmatpush.msra.mxu2 %v734_v42 }
 0xd0a   :  { %v578_v44 = vsel %vm577_vm15, %v571_v43, %v506_v7  ;;  %v733_v43 = vld [vmem:[#allocation2 + $0x78] sm:$0xff]  ;;  %vm945_vm15 = vcmask 15360  }
 0xd0b   :  { %580 = vrot.lane.b32.xlu2 %v578_v44, %s1775_s26  ;;  %774 = vmatpush.msra.mxu2 %v733_v43 }
 0xd0d   :  { %v62_v45 = vpop.permute.xlu0 %61 }
 0xd0e   :  { %vm72_vm1 = vcmp.eq.s32.totalorder %v1811_v11, %v62_v45  ;;  %v731_v45 = vld [vmem:[#allocation2 + $0x68] sm:$0xff] }
 0xd0f   :  { %v1584_v46 = vsel %vm72_vm1, 1.0, %v1773_v13 }
 0xd10   :  { %1592 = vmatmul.msk.f32.gmra.mxu0 %vm98_vm0, %v1584_v46  ;;  %v1968_v46 = vld [vmem:[%s2251_s1] sm:$0xff] }
 0xd65   :  { %v581_v47 = vpop.permute.xlu2 %580 }
 0xd66   :  { %1605 = vmatmul.msk.f32.vlgmr.msrb.gmra.mxu3 %vm217_vm8, %v581_v47  ;;  %v1975_v47 = vld [vmem:[%s2251_s1 + $0x8] sm:$0xff] }
 0xd8d   :  { %v158_v52 = vpop.f32.mrf.mxu0 }
 0xde9   :  { %v601_v48 = vpop.f32.mrf.mxu3 }
 0xdea   :  { %v624_v49 = vadd.f32 %v601_v48, %v1866_v51  ;;  %v604_v53 = vadd.f32 %v601_v48, %v158_v52  ;;  %v813_v48 = vld [vmem:[#allocation2 + $0xa8] sm:$0xff] }
 0xdeb   :  { %833 = vmatpush.msra.mxu3 %v813_v48 }
 0xdec   :  { %626 = vrot.lane.b32.xlu1 %v624_v49, %s1774_s2  ;;  %v1606_v54 = vmul.f32 -1.442695, %v604_v53  ;;  %v812_v49 = vld [vmem:[#allocation2 + $0xa0] sm:$0xff]  ;;  %v810_v53 = vld [vmem:[#allocation2 + $0x90] sm:$0xff] }
 0xded   :  { %834 = vmatpush.msra.mxu3 %v812_v49 }
 0xdee   :  { %1697 = vpow2.f32 %v1606_v54 }
 0xdf4   :  { %647 = vperm.xlu1 %1639, %v645_v50   ;;  %v1698_v55 = vpop.eup %1697  ;;  %v1982_v50 = vld [vmem:[%s2251_s1 + $0x10] sm:$0xff] }
 0xdf5   :  { %v608_v56 = vadd.f32 1.0, %v1698_v55 }
 0xdf7   :  { %1699 = vrcp.f32 %v608_v56  ;;  %v620_v62 = vand.u32 2147483648, %v608_v56  ;;  %vm614_vm4 = vweird.f32 %v608_v56  ;;  %v618_v63 = vand.u32 2147483647, %v608_v56 }
 0xdf9   :  { %v621_v2 = vor.u32 1.1754944e-38, %v620_v62  ;;  %vm619_vm6 = vcmp.eq.f32.partialorder %v618_v63, 8.507059e+37  ;;  %v1999_v62 = vld [vmem:[%s2251_s1 + $0x20] sm:$0xff]  ;;  %v2006_v63 = vld [vmem:[%s2251_s1 + $0x28] sm:$0xff] }
 0xdfd   :  { %v1700_v57 = vpop.eup %1699 }
 0xdfe   :  { %v610_v58 = vmul.f32 %v1700_v57, %v608_v56  ;;  %vm615_vm3 = vweird.f32 %v1700_v57 }
 0xdff   :  { %vm616_vm5 = vmor %vm614_vm4, %vm615_vm3 }
 0xe00   :  { %v611_v59 = vsub.f32 1.0, %v610_v58 }
 0xe02   :  { %v612_v60 = vmul.f32 %v1700_v57, %v611_v59 }
 0xe04   :  { %v613_v61 = vadd.f32 %v1700_v57, %v612_v60  ;;  %v1990_v60 = vld [vmem:[%s2251_s1 + $0x18] sm:$0xff] }
 0xe06   :  { %v617_v1 = vsel %vm616_vm5, %v1700_v57, %v613_v61 }
 0xe07   :  { %v622_v4 = vsel %vm619_vm6, %v621_v2, %v617_v1  ;;  %v2013_v1 = vld [vmem:[%s2251_s1 + $0x30] sm:$0xff]  ;;  %v2020_v2 = vld [vmem:[%s2251_s1 + $0x38] sm:$0xff] }
 0xe08   :  { %v636_v38 = vsub.f32 1.0, %v622_v4  ;;  %v642_v9 = vmul.f32 %v622_v4, %v578_v44 }
 0xe5e   :  { %v627_v3 = vpop.permute.xlu1 %626 }
 0xe5f   :  { %v629_v5 = vmul.f32 %v627_v3, %v622_v4  ;;  %v877_v4 = vld [vmem:[#allocation2 + $0xd0] sm:$0xff] }
 0xe60   :  { %916 = vmatpush.msrb.mxu1 %v877_v4 }
 0xe61   :  { %631 = vrot.lane.b32.xlu2 %v629_v5, %s1774_s2  ;;  %v876_v5 = vld [vmem:[#allocation2 + $0xc8] sm:$0xff] }
 0xe62   :  { %917 = vmatpush.msrb.mxu1 %v876_v5  ;;  %v2036_v5 = vld [vmem:[#allocation2 + $0xd8] ss:$0 sm:$0xff] }
 0xe66   :  { %v648_v39 = vpop.permute.xlu1 %647 }
 0xe67   :  { %vm649_vm7 = vcmp.eq.s32.totalorder %v648_v39, 1 }
 0xebb   :  { %v632_v6 = vpop.permute.xlu2 %631 }
 0xebc   :  { %v634_v7 = vadd.f32 %v632_v6, %v158_v52  ;;  %v811_v52 = vld [vmem:[#allocation2 + $0x98] sm:$0xff]  ;;  %v875_v6 = vld [vmem:[#allocation2 + $0xc0] sm:$0xff] }
 0xebd   :  { %835 = vmatpush.msra.mxu3 %v811_v52  ;;  %918 = vmatpush.msrb.mxu1 %v875_v6 }
 0xebe   :  { %1701 = vtanh.f32 %v634_v7  ;;  %v874_v7 = vld [vmem:[#allocation2 + $0xb8] sm:$0xff] }
 0xebf   :  { %836 = vmatpush.msra.mxu3 %v810_v53  ;;  %919 = vmatpush.msrb.mxu1 %v874_v7 }
 0xec4   :  { %v1702_v36 = vpop.eup %1701 }
 0xec5   :  { %638 = vrot.lane.b32.xlu0 %v1702_v36, %s1775_s26 }
 0xecd   :  { %64 = vperm.xlu0 %1638, %v39_v37  }
 0xf37   :  { %v639_v8 = vpop.permute.xlu0 %638 }
 0xf38   :  { %v641_v10 = vmul.f32 %v639_v8, %v636_v38  ;;  %v1655_v38 = vld [vmem:[#allocation2 + $0x88] ss:$0 sm:$0xff]  ;;  %v1656_v8 = vld [vmem:[#allocation2 + $0xb0] ss:$0 sm:$0xff] }
 0xf3a   :  { %v643_v12 = vadd.f32 %v642_v9, %v641_v10 }
 0xf3c   :  { %v1951_v14 = vsel %vm649_vm7, %v643_v12, %v578_v44  ;;  %v732_v44 = vld [vmem:[#allocation2 + $0x70] sm:$0xff] }
 0xf3d   :  { %652 = vrot.lane.b32.xlu2 %v1951_v14, %s1775_s26  ;;  %775 = vmatpush.msra.mxu2 %v732_v44 }
 0xf3f   :  { %v65_v15 = vpop.permute.xlu0 %64  ;;  %776 = vmatpush.msra.mxu2 %v731_v45 }
 0xf40   :  { %vm73_vm9 = vcmp.eq.s32.totalorder %v1811_v11, %v65_v15  ;;  %1609 = vmatmul.msk.f32.vlgmr.msra.gmra.mxu2 %vm217_vm8, %v1968_v46 }
 0xf41   :  { %v1585_v16 = vsel %vm73_vm9, 1.0, %v1773_v13 }
 0xf42   :  { %1593 = vmatmul.msk.f32.gmra.mxu0 %vm98_vm0, %v1585_v16 }
 0xf48   :  { %1610 = vmatmul.msk.f32.gmra.mxu2 %vm217_vm8, %v1975_v47 }
 0xf50   :  { %1611 = vmatmul.msk.f32.gmra.mxu2 %vm217_vm8, %v1982_v50 }
 0xf58   :  { %1612 = vmatmul.msk.f32.gmra.mxu2 %vm217_vm8, %v1990_v60 }
 0xf60   :  { %1613 = vmatmul.msk.f32.gmra.mxu2 %vm217_vm8, %v1999_v62 }
 0xf68   :  { %1614 = vmatmul.msk.f32.gmra.mxu2 %vm217_vm8, %v2006_v63 }
 0xf70   :  { %1615 = vmatmul.msk.f32.gmra.mxu2 %vm217_vm8, %v2013_v1 }
 0xf78   :  { %1616 = vmatmul.msk.f32.gmra.mxu2 %vm217_vm8, %v2020_v2 }
 0xf97   :  { %v653_v17 = vpop.permute.xlu2 %652 }
 0xf98   :  { %1607 = vmatmul.msk.f32.vlgmr.msra.gmra.mxu1 %vm217_vm8, %v653_v17 }
 0xfbf   :  { %v161_v21 = vpop.f32.mrf.mxu0 }
 0xfc3   :  { %v778_v36 = vpop.f32.mrf.mxu2 }
 0xfc4   :  { %v779_v39 = vadd.f32 %v1655_v38, %v778_v36 }
 0xfcb   :  { %v781_v37 = vpop.f32.mrf.mxu2 }
 0xfcc   :  { %v782_v17 = vadd.f32 %v1655_v38, %v781_v37 }
 0xfd3   :  { %v784_v12 = vpop.f32.mrf.mxu2 }
0x1015   :  { %v673_v18 = vpop.f32.mrf.mxu1 }
0x1016   :  { %v696_v19 = vadd.f32 %v673_v18, %v1866_v51  ;;  %v676_v22 = vadd.f32 %v673_v18, %v161_v21 }
0x1018   :  { %698 = vrot.lane.b32.xlu1 %v696_v19, %s1774_s2  ;;  %v1608_v11 = vmul.f32 -1.442695, %v676_v22  ;;  %v787_v22 = vpop.f32.mrf.mxu2 }
0x101a   :  { %1703 = vpow2.f32 %v1608_v11  ;;  %v785_v11 = vadd.f32 %v1655_v38, %v784_v12 }
0x1020   :  { %719 = vperm.xlu1 %1639, %v717_v20   ;;  %v1704_v13 = vpop.eup %1703  ;;  %v803_v20 = vmax.f32 %v782_v17, 0.0 }
0x1021   :  { %v680_v23 = vadd.f32 1.0, %v1704_v13 }
0x1023   :  { %1705 = vrcp.f32 %v680_v23  ;;  %v692_v51 = vand.u32 2147483648, %v680_v23  ;;  %vm686_vm11 = vweird.f32 %v680_v23  ;;  %v690_v29 = vand.u32 2147483647, %v680_v23 }
0x1025   :  { %v693_v30 = vor.u32 1.1754944e-38, %v692_v51  ;;  %vm691_vm13 = vcmp.eq.f32.partialorder %v690_v29, 8.507059e+37 }
0x1029   :  { %v1706_v24 = vpop.eup %1705 }
0x102a   :  { %v682_v25 = vmul.f32 %v1706_v24, %v680_v23  ;;  %vm687_vm0 = vweird.f32 %v1706_v24 }
0x102b   :  { %vm688_vm12 = vmor %vm686_vm11, %vm687_vm0 }
0x102c   :  { %v683_v26 = vsub.f32 1.0, %v682_v25 }
0x102e   :  { %v684_v27 = vmul.f32 %v1706_v24, %v683_v26  ;;  %v790_v26 = vpop.f32.mrf.mxu2 }
0x1030   :  { %v685_v28 = vadd.f32 %v1706_v24, %v684_v27  ;;  %v788_v27 = vadd.f32 %v1655_v38, %v787_v22 }
0x1032   :  { %v689_v34 = vsel %vm688_vm12, %v1706_v24, %v685_v28  ;;  %v804_v24 = vmax.f32 %v785_v11, 0.0  ;;  %v805_v29 = vmax.f32 %v788_v27, 0.0 }
0x1033   :  { %v694_v32 = vsel %vm691_vm13, %v693_v30, %v689_v34  ;;  %v791_v30 = vadd.f32 %v1655_v38, %v790_v26 }
0x1034   :  { %v708_v54 = vsub.f32 1.0, %v694_v32  ;;  %v714_v57 = vmul.f32 %v694_v32, %v1951_v14 }
0x108a   :  { %v699_v31 = vpop.permute.xlu1 %698 }
0x108b   :  { %v701_v33 = vmul.f32 %v699_v31, %v694_v32 }
0x108d   :  { %703 = vrot.lane.b32.xlu2 %v701_v33, %s1774_s2  ;;  %v793_v33 = vpop.f32.mrf.mxu2 }
0x1092   :  { %v720_v56 = vpop.permute.xlu1 %719 }
0x1093   :  { %vm721_vm14 = vcmp.eq.s32.totalorder %v720_v56, 1 }
0x1095   :  { %v796_v44 = vpop.f32.mrf.mxu2 }
0x1096   :  { %v797_v49 = vadd.f32 %v1655_v38, %v796_v44 }
0x109d   :  { %v799_v56 = vpop.f32.mrf.mxu2 }
0x10e7   :  { %v704_v35 = vpop.permute.xlu2 %703 }
0x10e8   :  { %v706_v40 = vadd.f32 %v704_v35, %v161_v21  ;;  %v806_v35 = vmax.f32 %v791_v30, 0.0 }
0x10ea   :  { %1707 = vtanh.f32 %v706_v40 }
0x10f0   :  { %v1708_v41 = vpop.eup %1707 }
0x10f1   :  { %710 = vrot.lane.b32.xlu0 %v1708_v41, %s1775_s26  ;;  %v794_v41 = vadd.f32 %v1655_v38, %v793_v33 }
0x10f3   :  { %v807_v45 = vmax.f32 %v794_v41, 0.0 }
0x1163   :  { %v711_v55 = vpop.permute.xlu0 %710 }
0x1164   :  { %v713_v58 = vmul.f32 %v711_v55, %v708_v54  ;;  %v808_v54 = vmax.f32 %v797_v49, 0.0 }
0x1166   :  { %v715_v59 = vadd.f32 %v714_v57, %v713_v58  ;;  %v800_v57 = vadd.f32 %v1655_v38, %v799_v56 }
0x1168   :  { %v722_v61 = vsel %vm721_vm14, %v715_v59, %v1951_v14  ;;  %v802_v14 = vmax.f32 %v779_v39, 0.0 }
0x1169   :  { %817 = vrot.lane.b32.xlu2 %v722_v61, %s1775_s26  ;;  %v809_v61 = vmax.f32 %v800_v57, 0.0 }
0x11c3   :  { %v818_v3 = vpop.permute.xlu2 %817 }
0x11c4   :  { %1617 = vmatmul.msk.f32.vlgmr.msra.gmra.mxu3 %vm217_vm8, %v818_v3 }
0x1247   :  { %v838_v9 = vpop.f32.mrf.mxu3 }
0x1248   :  { %v2025_v10 = vadd.f32 %v1656_v8, %v838_v9 }
0x124a   :  { %v841_v15 = vmax.f32 %v2025_v10, 0.0 }
0x124c   :  { %v850_v16 = vperm.slane %v841_v15, 0  ;;  %v843_v19 = vrot.slane %v841_v15, 1  ;;  %v844_v23 = vrot.slane %v841_v15, 2  ;;  %v845_v51 = vrot.slane %v841_v15, 3 }
0x124d   :  { %v846_v32 = vrot.slane %v841_v15, 4  ;;  %v847_v43 = vrot.slane %v841_v15, 5  ;;  %v848_v53 = vrot.slane %v841_v15, 6  ;;  %v849_v58 = vrot.slane %v841_v15, 7 }
0x124e   :  { %v866_v18 = vmul.f32 %v850_v16, %v802_v14  ;;  %v851_v21 = vperm.slane %v843_v19, 0  ;;  %v852_v25 = vperm.slane %v844_v23, 0  ;;  %v853_v34 = vperm.slane %v845_v51, 0 }
0x124f   :  { %v854_v40 = vperm.slane %v846_v32, 0  ;;  %v855_v48 = vperm.slane %v847_v43, 0  ;;  %v856_v55 = vperm.slane %v848_v53, 0  ;;  %v857_v3 = vperm.slane %v849_v58, 0 }
0x1250   :  { %1618 = vmatmul.msk.f32.vlgmr.msrb.gmra.mxu1 %vm217_vm8, %v866_v18  ;;  %v867_v13 = vmul.f32 %v851_v21, %v803_v20  ;;  %v868_v28 = vmul.f32 %v852_v25, %v804_v24  ;;  %v869_v31 = vmul.f32 %v853_v34, %v805_v29 }
0x1251   :  { %v870_v42 = vmul.f32 %v854_v40, %v806_v35  ;;  %v871_v52 = vmul.f32 %v855_v48, %v807_v45  ;;  %v872_v59 = vmul.f32 %v856_v55, %v808_v54  ;;  %v873_v4 = vmul.f32 %v857_v3, %v809_v61 }
0x1252   :  { %v1776_v40 = vmov 1  }
0x1253   :  { %1641 = vset.pattern.permute.xlu2 %v1776_v40 }
0x1258   :  { %1619 = vmatmul.msk.f32.gmra.mxu1 %vm217_vm8, %v867_v13 }
0x1260   :  { %1620 = vmatmul.msk.f32.gmra.mxu1 %vm217_vm8, %v868_v28 }
0x1268   :  { %1621 = vmatmul.msk.f32.gmra.mxu1 %vm217_vm8, %v869_v31 }
0x1270   :  { %1622 = vmatmul.msk.f32.gmra.mxu1 %vm217_vm8, %v870_v42 }
0x1278   :  { %1623 = vmatmul.msk.f32.gmra.mxu1 %vm217_vm8, %v871_v52 }
0x1280   :  { %1624 = vmatmul.msk.f32.gmra.mxu1 %vm217_vm8, %v872_v59 }
0x1288   :  { %1625 = vmatmul.msk.f32.gmra.mxu1 %vm217_vm8, %v873_v4 }
0x12cd   :  { %v921_v6 = vpop.f32.mrf.mxu1 }
0x12ce   :  { %v922_v7 = vadd.f32 %v2036_v5, %v921_v6 }
0x12d0   :  { %v946_v36 = vsel %vm945_vm15, %v922_v7, -inf }
0x12d1   :  { %v947_v37 = vrot.slane %v946_v36, 4 }
0x12d3   :  { %v948_v8 = vmax.f32 %v946_v36, %v947_v37 }
0x12d5   :  { %v949_v38 = vrot.slane %v948_v8, 2  ;;  %v924_v39 = vpop.f32.mrf.mxu1 }
0x12d6   :  { %v925_v9 = vadd.f32 %v2036_v5, %v924_v39 }
0x12d7   :  { %v950_v12 = vmax.f32 %v948_v8, %v949_v38 }
0x12d8   :  { %v953_v14 = vsel %vm945_vm15, %v925_v9, -inf }
0x12d9   :  { %v951_v15 = vrot.slane %v950_v12, 1  ;;  %v954_v16 = vrot.slane %v953_v14, 4 }
0x12db   :  { %v952_v17 = vmax.f32 %v950_v12, %v951_v15  ;;  %v955_v18 = vmax.f32 %v953_v14, %v954_v16 }
0x12dd   :  { %v1002_v19 = vsub.f32 %v922_v7, %v952_v17  ;;  %v956_v20 = vrot.slane %v955_v18, 2  ;;  %v927_v21 = vpop.f32.mrf.mxu1 }
0x12de   :  { %v928_v22 = vadd.f32 %v2036_v5, %v927_v21 }
0x12df   :  { %v1010_v11 = vmul.f32 1.442695, %v1002_v19  ;;  %v957_v13 = vmax.f32 %v955_v18, %v956_v20 }
0x12e0   :  { %v960_v23 = vsel %vm945_vm15, %v928_v22, -inf }
0x12e1   :  { %1709 = vpow2.f32 %v1010_v11  ;;  %v958_v24 = vrot.slane %v957_v13, 1  ;;  %v961_v25 = vrot.slane %v960_v23, 4 }
0x12e3   :  { %v959_v26 = vmax.f32 %v957_v13, %v958_v24  ;;  %v962_v27 = vmax.f32 %v960_v23, %v961_v25 }
0x12e5   :  { %v1003_v28 = vsub.f32 %v925_v9, %v959_v26  ;;  %v963_v51 = vrot.slane %v962_v27, 2  ;;  %v930_v29 = vpop.f32.mrf.mxu1 }
0x12e6   :  { %v931_v34 = vadd.f32 %v2036_v5, %v930_v29 }
0x12e7   :  { %v2045_v30 = vpop.eup %1709  ;;  %v1012_v31 = vmul.f32 1.442695, %v1003_v28  ;;  %v964_v32 = vmax.f32 %v962_v27, %v963_v51 }
0x12e8   :  { %v1026_v33 = vsel %vm945_vm15, %v2045_v30, 0.0  ;;  %v967_v35 = vsel %vm945_vm15, %v931_v34, -inf }
0x12e9   :  { %v1027_v41 = vrot.slane %v1026_v33, 4  ;;  %1711 = vpow2.f32 %v1012_v31  ;;  %v965_v42 = vrot.slane %v964_v32, 1  ;;  %v968_v43 = vrot.slane %v967_v35, 4 }
0x12eb   :  { %v1028_v44 = vadd.f32 %v1027_v41, %v1026_v33  ;;  %v966_v45 = vmax.f32 %v964_v32, %v965_v42  ;;  %v969_v48 = vmax.f32 %v967_v35, %v968_v43 }
0x12ed   :  { %v1029_v49 = vrot.slane %v1028_v44, 2  ;;  %v1004_v52 = vsub.f32 %v928_v22, %v966_v45  ;;  %v970_v53 = vrot.slane %v969_v48, 2  ;;  %v933_v54 = vpop.f32.mrf.mxu1 }
0x12ee   :  { %v934_v55 = vadd.f32 %v2036_v5, %v933_v54 }
0x12ef   :  { %v2052_v56 = vpop.eup %1711  ;;  %v1030_v57 = vadd.f32 %v1029_v49, %v1028_v44  ;;  %v1014_v58 = vmul.f32 1.442695, %v1004_v52  ;;  %v971_v59 = vmax.f32 %v969_v48, %v970_v53 }
0x12f0   :  { %v1033_v61 = vsel %vm945_vm15, %v2052_v56, 0.0  ;;  %v974_v3 = vsel %vm945_vm15, %v934_v55, -inf }
0x12f1   :  { %v1031_v4 = vrot.slane %v1030_v57, 1  ;;  %v1034_v6 = vrot.slane %v1033_v61, 4  ;;  %1713 = vpow2.f32 %v1014_v58  ;;  %v972_v7 = vrot.slane %v971_v59, 1 }
0x12f2   :  { %v975_v36 = vrot.slane %v974_v3, 4 }
0x12f3   :  { %v1032_v37 = vadd.f32 %v1031_v4, %v1030_v57  ;;  %v1035_v8 = vadd.f32 %v1034_v6, %v1033_v61  ;;  %v973_v38 = vmax.f32 %v971_v59, %v972_v7 }
0x12f4   :  { %v976_v39 = vmax.f32 %v974_v3, %v975_v36 }
0x12f5   :  { %1715 = vrcp.f32 %v1032_v37  ;;  %v1036_v9 = vrot.slane %v1035_v8, 2  ;;  %v1005_v12 = vsub.f32 %v931_v34, %v973_v38  ;;  %v936_v14 = vpop.f32.mrf.mxu1  ;;  %v1091_v42 = vand.u32 2147483647, %v1032_v37 }
0x12f6   :  { %v977_v15 = vrot.slane %v976_v39, 2  ;;  %v2058_v16 = vadd.f32 %v2036_v5, %v936_v14  ;;  %v1093_v48 = vand.u32 2147483648, %v1032_v37  ;;  %vm1087_vm2 = vweird.f32 %v1032_v37 }
0x12f7   :  { %v2060_v17 = vpop.eup %1713  ;;  %v1037_v18 = vadd.f32 %v1036_v9, %v1035_v8  ;;  %v1016_v19 = vmul.f32 1.442695, %v1005_v12  ;;  %vm2078_vm3 = vcmp.eq.f32.partialorder %v1091_v42, 8.507059e+37 }
0x12f8   :  { %v1040_v20 = vsel %vm945_vm15, %v2060_v17, 0.0  ;;  %v978_v21 = vmax.f32 %v976_v39, %v977_v15  ;;  %v981_v22 = vsel %vm945_vm15, %v2058_v16, -inf  ;;  %v1094_v39 = vor.u32 1.1754944e-38, %v1093_v48 }
0x12f9   :  { %v1038_v11 = vrot.slane %v1037_v18, 1  ;;  %v1041_v13 = vrot.slane %v1040_v20, 4  ;;  %1717 = vpow2.f32 %v1016_v19  ;;  %v982_v23 = vrot.slane %v981_v22, 4 }
0x12fa   :  { %v979_v24 = vrot.slane %v978_v21, 1 }
0x12fb   :  { %v1716_v25 = vpop.eup %1715  ;;  %v2066_v26 = vadd.f32 %v1038_v11, %v1037_v18  ;;  %v1042_v27 = vadd.f32 %v1041_v13, %v1040_v20  ;;  %v983_v28 = vmax.f32 %v981_v22, %v982_v23 }
0x12fc   :  { %v980_v51 = vmax.f32 %v978_v21, %v979_v24  ;;  %v1083_v29 = vmul.f32 %v1716_v25, %v1032_v37  ;;  %vm1088_vm1 = vweird.f32 %v1716_v25 }
0x12fd   :  { %1719 = vrcp.f32 %v2066_v26  ;;  %v1043_v34 = vrot.slane %v1042_v27, 2  ;;  %v984_v31 = vrot.slane %v983_v28, 2  ;;  %v939_v32 = vpop.f32.mrf.mxu1  ;;  %vm1089_vm4 = vmor %vm1087_vm2, %vm1088_vm1  ;;  %v1106_v12 = vand.u32 2147483647, %v2066_v26 }
0x12fe   :  { %v1006_v33 = vsub.f32 %v934_v55, %v980_v51  ;;  %v2070_v35 = vadd.f32 %v2036_v5, %v939_v32  ;;  %v1084_v41 = vsub.f32 1.0, %v1083_v29  ;;  %v1108_v22 = vand.u32 2147483648, %v2066_v26 }
0x12ff   :  { %v2072_v43 = vpop.eup %1717  ;;  %v1044_v44 = vadd.f32 %v1043_v34, %v1042_v27  ;;  %v985_v45 = vmax.f32 %v983_v28, %v984_v31  ;;  %vm1102_vm6 = vweird.f32 %v2066_v26  ;;  %vm1107_vm9 = vcmp.eq.f32.partialorder %v1106_v12, 8.507059e+37 }
0x1300   :  { %v1047_v49 = vsel %vm945_vm15, %v2072_v43, 0.0  ;;  %v1018_v52 = vmul.f32 1.442695, %v1006_v33  ;;  %v988_v53 = vsel %vm945_vm15, %v2070_v35, -inf  ;;  %v1085_v54 = vmul.f32 %v1716_v25, %v1084_v41 }
0x1301   :  { %v1045_v55 = vrot.slane %v1044_v44, 1  ;;  %v1048_v57 = vrot.slane %v1047_v49, 4  ;;  %v986_v58 = vrot.slane %v985_v45, 1  ;;  %v989_v59 = vrot.slane %v988_v53, 4 }
0x1302   :  { %1721 = vpow2.f32 %v1018_v52  ;;  %v1086_v61 = vadd.f32 %v1716_v25, %v1085_v54  ;;  %v1109_v41 = vor.u32 1.1754944e-38, %v1108_v22 }
0x1303   :  { %v1720_v4 = vpop.eup %1719  ;;  %v2082_v6 = vadd.f32 %v1045_v55, %v1044_v44  ;;  %v1049_v7 = vadd.f32 %v1048_v57, %v1047_v49  ;;  %v987_v36 = vmax.f32 %v985_v45, %v986_v58  ;;  %v990_v8 = vmax.f32 %v988_v53, %v989_v59 }
0x1304   :  { %v1090_v38 = vsel %vm1089_vm4, %v1716_v25, %v1086_v61  ;;  %v1098_v9 = vmul.f32 %v1720_v4, %v2066_v26  ;;  %vm1103_vm5 = vweird.f32 %v1720_v4 }
0x1305   :  { %1723 = vrcp.f32 %v2082_v6  ;;  %v1050_v37 = vrot.slane %v1049_v7, 2  ;;  %v1007_v14 = vsub.f32 %v2058_v16, %v987_v36  ;;  %v991_v15 = vrot.slane %v990_v8, 2  ;;  %v942_v18 = vpop.f32.mrf.mxu1  ;;  %vm1104_vm7 = vmor %vm1102_vm6, %vm1103_vm5 }
0x1306   :  { %v2090_v19 = vadd.f32 %v2036_v5, %v942_v18  ;;  %v1095_v20 = vsel %vm2078_vm3, %v1094_v39, %v1090_v38  ;;  %v1099_v21 = vsub.f32 1.0, %v1098_v9  ;;  %v1121_v59 = vand.u32 2147483647, %v2082_v6 }
0x1307   :  { %v1051_v11 = vadd.f32 %v1050_v37, %v1049_v7  ;;  %v1020_v13 = vmul.f32 1.442695, %v1007_v14  ;;  %v992_v23 = vmax.f32 %v990_v8, %v991_v15  ;;  %v1096_v24 = vmul.f32 %v2045_v30, %v1095_v20 }
0x1308   :  { %v2096_v25 = vpop.eup %1721  ;;  %v995_v16 = vsel %vm945_vm15, %v2090_v19, -inf  ;;  %v1100_v27 = vmul.f32 %v1720_v4, %v1099_v21  ;;  %v1123_v61 = vand.u32 2147483648, %v2082_v6  ;;  %vm1117_vm0 = vweird.f32 %v2082_v6 }
0x1309   :  { %v1052_v5 = vrot.slane %v1051_v11, 1  ;;  %v1054_v28 = vsel %vm945_vm15, %v2096_v25, 0.0  ;;  %1725 = vpow2.f32 %v1020_v13  ;;  %v993_v51 = vrot.slane %v992_v23, 1  ;;  %1370 = vperm.xlu2 %1641, %v1096_v24   ;;  %1202 = vst.msk [vmem:[%s2254_s4] sm:$0xff] %vm945_vm15, %v1096_v24  ;;  %1221 = vperm.xlu0 %1638, %v1096_v24  }
0x130a   :  { %v1055_v30 = vrot.slane %v1054_v28, 4  ;;  %v996_v29 = vrot.slane %v995_v16, 4  ;;  %v1101_v34 = vadd.f32 %v1720_v4, %v1100_v27  ;;  %vm1122_vm12 = vcmp.eq.f32.partialorder %v1121_v59, 8.507059e+37 }
0x130b   :  { %v1724_v31 = vpop.eup %1723  ;;  %v2107_v32 = vadd.f32 %v1052_v5, %v1051_v11  ;;  %v994_v33 = vmax.f32 %v992_v23, %v993_v51  ;;  %v1124_v12 = vor.u32 1.1754944e-38, %v1123_v61 }
0x130c   :  { %v1056_v42 = vadd.f32 %v1055_v30, %v1054_v28  ;;  %v997_v44 = vmax.f32 %v995_v16, %v996_v29  ;;  %v1105_v45 = vsel %vm1104_vm7, %v1720_v4, %v1101_v34  ;;  %v1113_v48 = vmul.f32 %v1724_v31, %v2082_v6 }
0x130d   :  { %1727 = vrcp.f32 %v2107_v32  ;;  %v1008_v49 = vsub.f32 %v2070_v35, %v994_v33  ;;  %v1110_v52 = vsel %vm1107_vm9, %v1109_v41, %v1105_v45  ;;  %vm1118_vm10 = vweird.f32 %v1724_v31 }
0x130e   :  { %v1057_v53 = vrot.slane %v1056_v42, 2  ;;  %v998_v26 = vrot.slane %v997_v44, 2  ;;  %v1111_v54 = vmul.f32 %v2052_v56, %v1110_v52  ;;  %v1114_v55 = vsub.f32 1.0, %v1113_v48  ;;  %vm1119_vm11 = vmor %vm1117_vm0, %vm1118_vm10 }
0x130f   :  { %v2114_v57 = vpop.eup %1725  ;;  %v1022_v58 = vmul.f32 1.442695, %v1008_v49  ;;  %v1136_v24 = vand.u32 2147483647, %v2107_v32  ;;  %v1138_v16 = vand.u32 2147483648, %v2107_v32  ;;  %vm1132_vm14 = vweird.f32 %v2107_v32 }
0x1310   :  { %v1058_v3 = vadd.f32 %v1057_v53, %v1056_v42  ;;  %v1061_v4 = vsel %vm945_vm15, %v2114_v57, 0.0  ;;  %v999_v7 = vmax.f32 %v997_v44, %v998_v26  ;;  %1226 = vperm.xlu1 %1639, %v1111_v54   ;;  %1203 = vst.msk [vmem:[%s2254_s4 + $0x8] sm:$0xff] %vm945_vm15, %v1111_v54  ;;  %v1115_v56 = vmul.f32 %v1724_v31, %v1114_v55 }
0x1311   :  { %v1062_v35 = vrot.slane %v1061_v4, 4  ;;  %1729 = vpow2.f32 %v1022_v58  ;;  %1642 = vset.pattern.permute.xlu0 %v1776_v40  ;;  %1643 = vset.pattern.permute.xlu2 %v1772_v0  ;;  %v1139_v34 = vor.u32 1.1754944e-38, %v1138_v16  ;;  %vm1137_vm2 = vcmp.eq.f32.partialorder %v1136_v24, 8.507059e+37 }
0x1312   :  { %v1059_v36 = vrot.slane %v1058_v3, 1  ;;  %v1000_v8 = vrot.slane %v999_v7, 1  ;;  %1374 = vperm.xlu0 %1642, %v1111_v54   ;;  %v1116_v38 = vadd.f32 %v1724_v31, %v1115_v56 }
0x1313   :  { %v1728_v39 = vpop.eup %1727  ;;  %v1063_v9 = vadd.f32 %v1062_v35, %v1061_v4 }
0x1314   :  { %v2128_v37 = vadd.f32 %v1059_v36, %v1058_v3  ;;  %v1001_v14 = vmax.f32 %v999_v7, %v1000_v8  ;;  %v1120_v15 = vsel %vm1119_vm11, %v1724_v31, %v1116_v38  ;;  %v1128_v18 = vmul.f32 %v1728_v39, %v2107_v32 }
0x1315   :  { %v1064_v20 = vrot.slane %v1063_v9, 2  ;;  %v1125_v21 = vsel %vm1122_vm12, %v1124_v12, %v1120_v15  ;;  %vm1133_vm13 = vweird.f32 %v1728_v39 }
0x1316   :  { %1731 = vrcp.f32 %v2128_v37  ;;  %v1009_v22 = vsub.f32 %v2090_v19, %v1001_v14  ;;  %v1126_v6 = vmul.f32 %v2060_v17, %v1125_v21  ;;  %v1129_v11 = vsub.f32 1.0, %v1128_v18  ;;  %vm1134_vm1 = vmor %vm1132_vm14, %vm1133_vm13 }
0x1317   :  { %v2134_v13 = vpop.eup %1729  ;;  %v1065_v23 = vadd.f32 %v1064_v20, %v1063_v9  ;;  %v1151_v32 = vand.u32 2147483647, %v2128_v37  ;;  %v1153_v53 = vand.u32 2147483648, %v2128_v37  ;;  %vm1147_vm4 = vweird.f32 %v2128_v37 }
0x1318   :  { %v1068_v27 = vsel %vm945_vm15, %v2134_v13, 0.0  ;;  %v1024_v5 = vmul.f32 1.442695, %v1009_v22  ;;  %1231 = vperm.xlu2 %1643, %v1126_v6   ;;  %1204 = vst.msk [vmem:[%s2254_s4 + $0x10] sm:$0xff] %vm945_vm15, %v1126_v6  ;;  %1644 = vset.pattern.permute.xlu1 %v1776_v40  ;;  %v1130_v17 = vmul.f32 %v1728_v39, %v1129_v11 }
0x1319   :  { %v1066_v19 = vrot.slane %v1065_v23, 1  ;;  %v1069_v28 = vrot.slane %v1068_v27, 4  ;;  %1378 = vperm.xlu1 %1644, %v1126_v6   ;;  %v1154_v4 = vor.u32 1.1754944e-38, %v1153_v53  ;;  %vm1152_vm6 = vcmp.eq.f32.partialorder %v1151_v32, 8.507059e+37 }
0x131a   :  { %1733 = vpow2.f32 %v1024_v5  ;;  %1645 = vset.pattern.permute.xlu0 %v1772_v0  ;;  %v1131_v51 = vadd.f32 %v1728_v39, %v1130_v17 }
0x131b   :  { %v1067_v30 = vadd.f32 %v1066_v19, %v1065_v23  ;;  %v1070_v29 = vadd.f32 %v1069_v28, %v1068_v27 }
0x131c   :  { %v1732_v31 = vpop.eup %1731  ;;  %v1135_v33 = vsel %vm1134_vm1, %v1728_v39, %v1131_v51 }
0x131d   :  { %1735 = vrcp.f32 %v1067_v30  ;;  %v1071_v41 = vrot.slane %v1070_v29, 2  ;;  %v1140_v42 = vsel %vm1137_vm2, %v1139_v34, %v1135_v33  ;;  %v1143_v44 = vmul.f32 %v1732_v31, %v2128_v37 }
0x131e   :  { %v1141_v45 = vmul.f32 %v2072_v43, %v1140_v42  ;;  %vm1148_vm3 = vweird.f32 %v1732_v31  ;;  %v1168_v39 = vand.u32 2147483648, %v1067_v30  ;;  %v1166_v14 = vand.u32 2147483647, %v1067_v30 }
0x131f   :  { %v1072_v48 = vadd.f32 %v1071_v41, %v1070_v29  ;;  %v1144_v49 = vsub.f32 1.0, %v1143_v44  ;;  %vm1149_vm5 = vmor %vm1147_vm4, %vm1148_vm3  ;;  %vm1162_vm9 = vweird.f32 %v1067_v30 }
0x1320   :  { %v2149_v52 = vpop.eup %1733  ;;  %1646 = vset.pattern.permute.xlu2 %v1776_v40  ;;  %1205 = vst.msk [vmem:[%s2254_s4 + $0x18] sm:$0xff] %vm945_vm15, %v1141_v45  ;;  %1236 = vperm.xlu0 %1645, %v1141_v45   ;;  %v1169_v20 = vor.u32 1.1754944e-38, %v1168_v39  ;;  %vm1167_vm0 = vcmp.eq.f32.partialorder %v1166_v14, 8.507059e+37 }
0x1321   :  { %v1073_v26 = vrot.slane %v1072_v48, 1  ;;  %v1075_v43 = vsel %vm945_vm15, %v2149_v52, 0.0  ;;  %1382 = vperm.xlu2 %1646, %v1141_v45   ;;  %1647 = vset.pattern.permute.xlu1 %v1772_v0  ;;  %v1145_v54 = vmul.f32 %v1732_v31, %v1144_v49 }
0x1322   :  { %v1076_v55 = vrot.slane %v1075_v43, 4 }
0x1323   :  { %v1736_v58 = vpop.eup %1735  ;;  %v1074_v59 = vadd.f32 %v1073_v26, %v1072_v48  ;;  %v1146_v61 = vadd.f32 %v1732_v31, %v1145_v54 }
0x1324   :  { %v1077_v3 = vadd.f32 %v1076_v55, %v1075_v43  ;;  %v1158_v7 = vmul.f32 %v1736_v58, %v1067_v30  ;;  %vm1163_vm7 = vweird.f32 %v1736_v58 }
0x1325   :  { %1737 = vrcp.f32 %v1074_v59  ;;  %v1150_v56 = vsel %vm1149_vm5, %v1732_v31, %v1146_v61  ;;  %vm1164_vm10 = vmor %vm1162_vm9, %vm1163_vm7  ;;  %v1183_v24 = vand.u32 2147483648, %v1074_v59  ;;  %v1181_v27 = vand.u32 2147483647, %v1074_v59 }
0x1326   :  { %v1078_v35 = vrot.slane %v1077_v3, 2  ;;  %v1155_v36 = vsel %vm1152_vm6, %v1154_v4, %v1150_v56  ;;  %v1159_v8 = vsub.f32 1.0, %v1158_v7  ;;  %vm1177_vm12 = vweird.f32 %v1074_v59 }
0x1327   :  { %v1156_v38 = vmul.f32 %v2096_v25, %v1155_v36  ;;  %v1184_v17 = vor.u32 1.1754944e-38, %v1183_v24  ;;  %vm1182_vm14 = vcmp.eq.f32.partialorder %v1181_v27, 8.507059e+37  ;;  %v1210_v24 = vld [vmem:[#allocation2 + $0xe0] sm:$0xff]  ;;  %vm1333_vm5 = vcmask 1042434  }
0x1328   :  { %v1079_v9 = vadd.f32 %v1078_v35, %v1077_v3  ;;  %v1160_v12 = vmul.f32 %v1736_v58, %v1159_v8  ;;  %v1213_v8 = vld [vmem:[#allocation2 + $0xf8] sm:$0xff]  ;;  %vm1335_vm6 = vcmask 1043459   ;;  %vm1337_vm7 = vcmask 1044484  }
0x1329   :  { %1206 = vst.msk [vmem:[%s2254_s4 + $0x20] sm:$0xff] %vm945_vm15, %v1156_v38  ;;  %1241 = vperm.xlu1 %1647, %v1156_v38   ;;  %1649 = vset.pattern.permute.xlu2 %v1772_v0  ;;  %vm1339_vm9 = vcmask 1045509  }
0x132a   :  { %v1080_v37 = vrot.slane %v1079_v9, 1  ;;  %v1161_v15 = vadd.f32 %v1736_v58, %v1160_v12  ;;  %1359 = vmatpush.msrb.mxu3 %v1213_v8  ;;  %v1212_v12 = vld [vmem:[#allocation2 + $0xf0] sm:$0xff] }
0x132b   :  { %v1738_v18 = vpop.eup %1737 }
0x132c   :  { %v1081_v25 = vadd.f32 %v1080_v37, %v1079_v9  ;;  %v1165_v21 = vsel %vm1164_vm10, %v1736_v58, %v1161_v15  ;;  %v1173_v22 = vmul.f32 %v1738_v18, %v1074_v59  ;;  %vm1178_vm11 = vweird.f32 %v1738_v18  ;;  %1360 = vmatpush.msrb.mxu3 %v1212_v12 }
0x132d   :  { %v1170_v6 = vsel %vm1167_vm0, %v1169_v20, %v1165_v21  ;;  %vm1179_vm13 = vmor %vm1177_vm12, %vm1178_vm11  ;;  %v1211_v21 = vld [vmem:[#allocation2 + $0xe8] sm:$0xff]  ;;  %vm1341_vm10 = vcmask 1046534   ;;  %vm1343_vm0 = vcmask 1047559   ;;  %vm1567_vm11 = vcmask 130048  }
0x132e   :  { %1739 = vrcp.f32 %v1081_v25  ;;  %v1171_v11 = vmul.f32 %v2114_v57, %v1170_v6  ;;  %v1174_v23 = vsub.f32 1.0, %v1173_v22  ;;  %v1198_v34 = vand.u32 2147483648, %v1081_v25  ;;  %1361 = vmatpush.msrb.mxu3 %v1211_v21 }
0x132f   :  { %v1196_v33 = vand.u32 2147483647, %v1081_v25  ;;  %vm1192_vm2 = vweird.f32 %v1081_v25 }
0x1330   :  { %1207 = vst.msk [vmem:[%s2254_s4 + $0x28] sm:$0xff] %vm945_vm15, %v1171_v11  ;;  %1246 = vperm.xlu2 %1649, %v1171_v11   ;;  %v1175_v16 = vmul.f32 %v1738_v18, %v1174_v23  ;;  %1362 = vmatpush.msrb.mxu3 %v1210_v24  ;;  %v1741_v24 = vld [vmem:[%s2251_s1 + $0x30] sm:$0xff] }
0x1331   :  { %1648 = vset.pattern.permute.xlu1 %v1776_v40  ;;  %vm1197_vm4 = vcmp.eq.f32.partialorder %v1196_v33, 8.507059e+37 }
0x1332   :  { %1386 = vperm.xlu1 %1648, %v1156_v38   ;;  %v1176_v5 = vadd.f32 %v1738_v18, %v1175_v16 }
0x1334   :  { %v1740_v19 = vpop.eup %1739  ;;  %v1180_v57 = vsel %vm1179_vm13, %v1738_v18, %v1176_v5 }
0x1335   :  { %v1185_v28 = vsel %vm1182_vm14, %v1184_v17, %v1180_v57  ;;  %v1188_v51 = vmul.f32 %v1740_v19, %v1081_v25  ;;  %vm1193_vm1 = vweird.f32 %v1740_v19 }
0x1336   :  { %v1186_v30 = vmul.f32 %v2134_v13, %v1185_v28  ;;  %vm1194_vm3 = vmor %vm1192_vm2, %vm1193_vm1  ;;  %v1199_v13 = vor.u32 1.1754944e-38, %v1198_v34 }
0x1337   :  { %v1189_v29 = vsub.f32 1.0, %v1188_v51 }
0x1338   :  { %1650 = vset.pattern.permute.xlu2 %v1776_v40  ;;  %1208 = vst.msk [vmem:[%s2254_s4 + $0x30] sm:$0xff] %vm945_vm15, %v1186_v30  ;;  %1251 = vperm.xlu0 %1645, %v1186_v30  }
0x1339   :  { %1390 = vperm.xlu2 %1650, %v1171_v11   ;;  %v1190_v31 = vmul.f32 %v1740_v19, %v1189_v29 }
0x133a   :  { %1651 = vset.pattern.permute.xlu1 %v1772_v0 }
0x133b   :  { %v1191_v41 = vadd.f32 %v1740_v19, %v1190_v31 }
0x133d   :  { %v1195_v42 = vsel %vm1194_vm3, %v1740_v19, %v1191_v41 }
0x133e   :  { %v1200_v44 = vsel %vm1197_vm4, %v1199_v13, %v1195_v42 }
0x133f   :  { %v1201_v45 = vmul.f32 %v2149_v52, %v1200_v44  ;;  %v1216_v44 = vld [vmem:[#allocation2 + $0x110] sm:$0xff] }
0x1340   :  { %1652 = vset.pattern.permute.xlu0 %v1776_v40 }
0x1341   :  { %1209 = vst.msk [vmem:[%s2254_s4 + $0x38] sm:$0xff] %vm945_vm15, %v1201_v45  ;;  %1256 = vperm.xlu1 %1651, %v1201_v45   ;;  %1504 = vrot.lane.b32.xlu2 %v2025_v10, %s1775_s26  ;;  %vm1331_vm15 = vcmask 1041409  }
0x1342   :  { %1394 = vperm.xlu0 %1652, %v1186_v30   ;;  %v1217_v30 = vld [vmem:[#allocation2 + $0x118] sm:$0xff] }
0x1343   :  { %1494 = vmatpush.msra.mxu3 %v1217_v30 }
0x1345   :  { %1495 = vmatpush.msra.mxu3 %v1216_v44 }
0x1349   :  { %1653 = vset.pattern.permute.xlu1 %v1776_v40 }
0x134a   :  { %1398 = vperm.xlu1 %1653, %v1201_v45   ;;  %v1215_v45 = vld [vmem:[#allocation2 + $0x108] sm:$0xff] }
0x134b   :  { %1496 = vmatpush.msra.mxu3 %v1215_v45 }
0x1363   :  { %v1371_v0 = vpop.permute.xlu2 %1370 }
0x1364   :  { %v1401_v26 = vmul.f32 %v1371_v0, %v1968_v46 }
0x1366   :  { %v1409_v58 = vsel %vm217_vm8, %v1401_v26, 0.0  ;;  %v1214_v26 = vld [vmem:[#allocation2 + $0x100] sm:$0xff] }
0x1367   :  { %v1410_v4 = vrot.slane %v1409_v58, 4  ;;  %1497 = vmatpush.msra.mxu3 %v1214_v26 }
0x1369   :  { %v1411_v14 = vadd.f32 %v1410_v4, %v1409_v58 }
0x136b   :  { %v1412_v16 = vrot.slane %v1411_v14, 2 }
0x136d   :  { %v1413_v31 = vadd.f32 %v1412_v16, %v1411_v14 }
0x1372   :  { %v1232_v32 = vpop.permute.xlu2 %1231 }
0x1373   :  { %v1261_v54 = vmul.f32 %v1232_v32, %v1982_v50 }
0x1375   :  { %v1281_v40 = vsel %vm217_vm8, %v1261_v54, 0.0 }
0x1376   :  { %v1282_v56 = vrot.slane %v1281_v40, 4 }
0x1378   :  { %v1283_v15 = vadd.f32 %v1282_v56, %v1281_v40 }
0x137a   :  { %v1284_v17 = vrot.slane %v1283_v15, 2 }
0x137b   :  { %v1222_v48 = vpop.permute.xlu0 %1221  ;;  %v1383_v43 = vpop.permute.xlu2 %1382 }
0x137c   :  { %v1259_v61 = vmul.f32 %v1222_v48, %v1968_v46  ;;  %v1404_v6 = vmul.f32 %v1383_v43, %v1990_v60  ;;  %v1285_v0 = vadd.f32 %v1284_v17, %v1283_v15 }
0x137e   :  { %v1267_v38 = vsel %vm217_vm8, %v1259_v61, 0.0 }
0x137f   :  { %v1268_v18 = vrot.slane %v1267_v38, 4 }
0x1381   :  { %v1269_v19 = vadd.f32 %v1268_v18, %v1267_v38 }
0x1382   :  { %v1227_v49 = vpop.permute.xlu1 %1226 }
0x1383   :  { %v1260_v55 = vmul.f32 %v1227_v49, %v1975_v47  ;;  %v1270_v48 = vrot.slane %v1269_v19, 2 }
0x1384   :  { %v1375_v52 = vpop.permute.xlu0 %1374 }
0x1385   :  { %v1274_v3 = vsel %vm217_vm8, %v1260_v55, 0.0  ;;  %v1402_v9 = vmul.f32 %v1375_v52, %v1975_v47 }
0x1386   :  { %v1275_v39 = vrot.slane %v1274_v3, 4 }
0x1387   :  { %v1416_v47 = vsel %vm217_vm8, %v1402_v9, 0.0 }
0x1388   :  { %v1276_v22 = vadd.f32 %v1275_v39, %v1274_v3  ;;  %v1417_v28 = vrot.slane %v1416_v47, 4  ;;  %v1286_v3 = vrot.slane %v1285_v0, 1 }
0x138a   :  { %v1247_v35 = vpop.permute.xlu2 %1246  ;;  %v1277_v57 = vrot.slane %v1276_v22, 2  ;;  %v1418_v52 = vadd.f32 %v1417_v28, %v1416_v47 }
0x138b   :  { %v1379_v53 = vpop.permute.xlu1 %1378  ;;  %v1264_v46 = vmul.f32 %v1247_v35, %v2006_v63 }
0x138c   :  { %v1403_v20 = vmul.f32 %v1379_v53, %v1982_v50  ;;  %v1419_v56 = vrot.slane %v1418_v52, 2 }
0x138d   :  { %v1302_v27 = vsel %vm217_vm8, %v1264_v46, 0.0  ;;  %v1287_v46 = vadd.f32 %v1286_v3, %v1285_v0 }
0x138e   :  { %v1423_v50 = vsel %vm217_vm8, %v1403_v20, 0.0  ;;  %v1303_v29 = vrot.slane %v1302_v27, 4 }
0x138f   :  { %v1424_v33 = vrot.slane %v1423_v50, 4 }
0x1390   :  { %v1304_v43 = vadd.f32 %v1303_v29, %v1302_v27 }
0x1392   :  { %v1237_v10 = vpop.permute.xlu0 %1236  ;;  %v1305_v8 = vrot.slane %v1304_v43, 2 }
0x1393   :  { %v1262_v7 = vmul.f32 %v1237_v10, %v1990_v60  ;;  %v1430_v60 = vsel %vm217_vm8, %v1404_v6, 0.0  ;;  %v1391_v41 = vpop.permute.xlu2 %1390  ;;  %v1414_v10 = vrot.slane %v1413_v31, 1 }
0x1394   :  { %v1431_v32 = vrot.slane %v1430_v60, 4  ;;  %v1406_v55 = vmul.f32 %v1391_v41, %v2006_v63 }
0x1395   :  { %v1288_v37 = vsel %vm217_vm8, %v1262_v7, 0.0  ;;  %v2216_v39 = vadd.f32 %v1414_v10, %v1413_v31 }
0x1396   :  { %v1289_v11 = vrot.slane %v1288_v37, 4  ;;  %v1432_v7 = vadd.f32 %v1431_v32, %v1430_v60  ;;  %v1444_v63 = vsel %vm217_vm8, %v1406_v55, 0.0  ;;  %v1742_v55 = vld [vmem:[%s2251_s1 + $0x38] sm:$0xff] }
0x1397   :  { %v1445_v21 = vrot.slane %v1444_v63, 4 }
0x1398   :  { %v1290_v34 = vadd.f32 %v1289_v11, %v1288_v37  ;;  %v1433_v20 = vrot.slane %v1432_v7, 2  ;;  %v1306_v11 = vadd.f32 %v1305_v8, %v1304_v43 }
0x1399   :  { %v1446_v30 = vadd.f32 %v1445_v21, %v1444_v63 }
0x139a   :  { %v1291_v54 = vrot.slane %v1290_v34, 2  ;;  %v1434_v45 = vadd.f32 %v1433_v20, %v1432_v7 }
0x139b   :  { %v1242_v59 = vpop.permute.xlu1 %1241 }
0x139c   :  { %v1263_v36 = vmul.f32 %v1242_v59, %v1999_v62  ;;  %v1425_v59 = vadd.f32 %v1424_v33, %v1423_v50  ;;  %v1292_v38 = vadd.f32 %v1291_v54, %v1290_v34  ;;  %v1307_v34 = vrot.slane %v1306_v11, 1 }
0x139d   :  { %v1435_v7 = vrot.slane %v1434_v45, 1 }
0x139e   :  { %v1295_v25 = vsel %vm217_vm8, %v1263_v36, 0.0  ;;  %v1426_v9 = vrot.slane %v1425_v59, 2  ;;  %v1308_v26 = vadd.f32 %v1307_v34, %v1306_v11 }
0x139f   :  { %v1296_v5 = vrot.slane %v1295_v25, 4 }
0x13a0   :  { %v1427_v27 = vadd.f32 %v1426_v9, %v1425_v59 }
0x13a1   :  { %v1297_v13 = vadd.f32 %v1296_v5, %v1295_v25  ;;  %v1420_v25 = vadd.f32 %v1419_v56, %v1418_v52 }
0x13a2   :  { %v1428_v41 = vrot.slane %v1427_v27, 1 }
0x13a3   :  { %v1298_v40 = vrot.slane %v1297_v13, 2 }
0x13a4   :  { %v1387_v23 = vpop.permute.xlu1 %1386  ;;  %v1429_v10 = vadd.f32 %v1428_v41, %v1427_v27  ;;  %v1511_v27 = vld [vmem:[#allocation2 + $0x140] sm:$0xff]  ;;  %v1659_v41 = vld [vmem:[#allocation2 + $0x148] ss:$0 sm:$0xff] }
0x13a5   :  { %v1405_v51 = vmul.f32 %v1387_v23, %v1999_v62  ;;  %v1278_v62 = vadd.f32 %v1277_v57, %v1276_v22  ;;  %v1299_v12 = vadd.f32 %v1298_v40, %v1297_v13  ;;  %v1293_v23 = vrot.slane %v1292_v38, 1 }
0x13a7   :  { %v1437_v53 = vsel %vm217_vm8, %v1405_v51, 0.0  ;;  %v1279_v36 = vrot.slane %v1278_v62, 1  ;;  %v1300_v5 = vrot.slane %v1299_v12, 1  ;;  %v1294_v31 = vadd.f32 %v1293_v23, %v1292_v38 }
0x13a8   :  { %v1438_v4 = vrot.slane %v1437_v53, 4 }
0x13a9   :  { %v1280_v47 = vadd.f32 %v1279_v36, %v1278_v62  ;;  %v1301_v13 = vadd.f32 %v1300_v5, %v1299_v12  ;;  %v1447_v62 = vrot.slane %v1446_v30, 2  ;;  %v1510_v5 = vld [vmem:[#allocation2 + $0x138] sm:$0xff] }
0x13aa   :  { %v1252_v42 = vpop.permute.xlu0 %1251  ;;  %v1439_v15 = vadd.f32 %v1438_v4, %v1437_v53 }
0x13ab   :  { %v1265_v49 = vmul.f32 %v1252_v42, %v2013_v1  ;;  %v1271_v1 = vadd.f32 %v1270_v48, %v1269_v19  ;;  %v1448_v56 = vadd.f32 %v1447_v62, %v1446_v30 }
0x13ac   :  { %v1440_v57 = vrot.slane %v1439_v15, 2 }
0x13ad   :  { %v1309_v58 = vsel %vm217_vm8, %v1265_v49, 0.0  ;;  %v1272_v37 = vrot.slane %v1271_v1, 1 }
0x13ae   :  { %v1310_v61 = vrot.slane %v1309_v58, 4  ;;  %v1441_v0 = vadd.f32 %v1440_v57, %v1439_v15  ;;  %v1436_v15 = vadd.f32 %v1435_v7, %v1434_v45  ;;  %v1540_v57 = vld [vmem:[#allocation2 + $0x160] sm:$0xff]  ;;  %v1660_v45 = vld [vmem:[#allocation2 + $0x170] ss:$0 sm:$0xff] }
0x13af   :  { %v1273_v50 = vadd.f32 %v1272_v37, %v1271_v1 }
0x13b0   :  { %v1311_v35 = vadd.f32 %v1310_v61, %v1309_v58  ;;  %v1442_v61 = vrot.slane %v1441_v0, 1 }
0x13b1   :  { %v1332_v29 = vsel %vm1331_vm15, %v1280_v47, %v1273_v50  ;;  %v1541_v50 = vld [vmem:[#allocation2 + $0x168] sm:$0xff] }
0x13b2   :  { %v1312_v14 = vrot.slane %v1311_v35, 2  ;;  %v1334_v32 = vsel %vm1333_vm5, %v1287_v46, %v1332_v29  ;;  %v1505_v29 = vpop.permute.xlu2 %1504 }
0x13b3   :  { %v1257_v18 = vpop.permute.xlu1 %1256  ;;  %v1336_v43 = vsel %vm1335_vm6, %v1294_v31, %v1334_v32  ;;  %v1539_v31 = vld [vmem:[#allocation2 + $0x158] sm:$0xff] }
0x13b4   :  { %v1266_v22 = vmul.f32 %v1257_v18, %v2020_v2  ;;  %v1395_v6 = vpop.permute.xlu0 %1394  ;;  %v1313_v17 = vadd.f32 %v1312_v14, %v1311_v35  ;;  %v1421_v2 = vrot.slane %v1420_v25, 1  ;;  %v1338_v59 = vsel %vm1337_vm7, %v1301_v13, %v1336_v43 }
0x13b5   :  { %v1407_v16 = vmul.f32 %v1741_v24, %v1395_v6  ;;  %v1340_v8 = vsel %vm1339_vm9, %v1308_v26, %v1338_v59  ;;  %v1443_v14 = vadd.f32 %v1442_v61, %v1441_v0  ;;  %v1449_v18 = vrot.slane %v1448_v56, 1 }
0x13b6   :  { %v1316_v19 = vsel %vm217_vm8, %v1266_v22, 0.0  ;;  %v1314_v42 = vrot.slane %v1313_v17, 1  ;;  %v1422_v49 = vadd.f32 %v1421_v2, %v1420_v25 }
0x13b7   :  { %v1317_v28 = vrot.slane %v1316_v19, 4  ;;  %v1451_v51 = vsel %vm217_vm8, %v1407_v16, 0.0  ;;  %v1450_v6 = vadd.f32 %v1449_v18, %v1448_v56 }
0x13b8   :  { %v1452_v60 = vrot.slane %v1451_v51, 4  ;;  %v1315_v40 = vadd.f32 %v1314_v42, %v1313_v17  ;;  %v1473_v38 = vsel %vm1331_vm15, %v1422_v49, %v2216_v39  ;;  %v1509_v17 = vld [vmem:[#allocation2 + $0x130] sm:$0xff] }
0x13b9   :  { %v1318_v33 = vadd.f32 %v1317_v28, %v1316_v19  ;;  %v1474_v12 = vsel %vm1333_vm5, %v1429_v10, %v1473_v38  ;;  %v1508_v19 = vld [vmem:[#allocation2 + $0x128] sm:$0xff] }
0x13ba   :  { %v1453_v44 = vadd.f32 %v1452_v60, %v1451_v51  ;;  %v1342_v9 = vsel %vm1341_vm10, %v1315_v40, %v1340_v8  ;;  %v1475_v25 = vsel %vm1335_vm6, %v1436_v15, %v1474_v12  ;;  %v1658_v51 = vld [vmem:[#allocation2 + $0x120] ss:$0 sm:$0xff] }
0x13bb   :  { %v1319_v48 = vrot.slane %v1318_v33, 2  ;;  %v1476_v22 = vsel %vm1337_vm7, %v1443_v14, %v1475_v25 }
0x13bc   :  { %v1454_v52 = vrot.slane %v1453_v44, 2  ;;  %v1399_v53 = vpop.permute.xlu1 %1398  ;;  %v1477_v23 = vsel %vm1339_vm9, %v1450_v6, %v1476_v22 }
0x13bd   :  { %v1320_v54 = vadd.f32 %v1319_v48, %v1318_v33  ;;  %v1408_v58 = vmul.f32 %v1742_v55, %v1399_v53  ;;  %v1538_v33 = vld [vmem:[#allocation2 + $0x150] sm:$0xff] }
0x13be   :  { %v1455_v1 = vadd.f32 %v1454_v52, %v1453_v44 }
0x13bf   :  { %v1321_v3 = vrot.slane %v1320_v54, 1  ;;  %v1458_v4 = vsel %vm217_vm8, %v1408_v58, 0.0 }
0x13c0   :  { %v1459_v35 = vrot.slane %v1458_v4, 4  ;;  %v1456_v46 = vrot.slane %v1455_v1, 1 }
0x13c1   :  { %v1322_v36 = vadd.f32 %v1321_v3, %v1320_v54 }
0x13c2   :  { %v1460_v63 = vadd.f32 %v1459_v35, %v1458_v4  ;;  %v1457_v39 = vadd.f32 %v1456_v46, %v1455_v1 }
0x13c3   :  { %v1344_v37 = vsel %vm1343_vm0, %v1322_v36, %v1342_v9 }
0x13c4   :  { %v1461_v20 = vrot.slane %v1460_v63, 2  ;;  %1626 = vmatmul.msk.f32.vlgmr.msrb.gmra.mxu3 %vm217_vm8, %v1344_v37  ;;  %v1478_v24 = vsel %vm1341_vm10, %v1457_v39, %v1477_v23 }
0x13c5   :  { %1529 = vmatpush.msrb.mxu3 %v1511_v27 }
0x13c6   :  { %v1462_v21 = vadd.f32 %v1461_v20, %v1460_v63 }
0x13c7   :  { %1530 = vmatpush.msrb.mxu3 %v1510_v5 }
0x13c8   :  { %v1463_v47 = vrot.slane %v1462_v21, 1 }
0x13c9   :  { %1531 = vmatpush.msrb.mxu3 %v1509_v17 }
0x13ca   :  { %v1464_v11 = vadd.f32 %v1463_v47, %v1462_v21 }
0x13cb   :  { %1532 = vmatpush.msrb.mxu3 %v1508_v19 }
0x13cc   :  { %v1479_v16 = vsel %vm1343_vm0, %v1464_v11, %v1478_v24 }
0x13cd   :  { %1627 = vmatmul.msk.f32.vlgmr.msra.gmra.mxu3 %vm217_vm8, %v1479_v16 }
0x13ce   :  { %1559 = vmatpush.msra.mxu3 %v1541_v50 }
0x13d0   :  { %1560 = vmatpush.msra.mxu3 %v1540_v57 }
0x13d2   :  { %1561 = vmatpush.msra.mxu3 %v1539_v31 }
0x13d4   :  { %1562 = vmatpush.msra.mxu3 %v1538_v33 }
0x1447   :  { %v1364_v28 = vpop.f32.mrf.mxu3 }
0x1448   :  { %v1368_v2 = vadd.f32 %v1658_v51, %v1364_v28 }
0x1450   :  { %v1499_v30 = vpop.f32.mrf.mxu3 }
0x1451   :  { %v1502_v60 = vadd.f32 %v1499_v30, %v1368_v2 }
0x1453   :  { %v1507_v34 = vmul.f32 %v1505_v29, %v1502_v60 }
0x1455   :  { %1628 = vmatmul.msk.f32.vlgmr.msrb.gmra.mxu3 %vm217_vm8, %v1507_v34 }
0x14d8   :  { %v1534_v13 = vpop.f32.mrf.mxu3 }
0x14d9   :  { %v1535_v42 = vadd.f32 %v1659_v41, %v1534_v13 }
0x14db   :  { %v1537_v44 = vmax.f32 %v1535_v42, 0.0 }
0x14dd   :  { %1629 = vmatmul.msk.f32.vlgmr.msra.gmra.mxu3 %vm217_vm8, %v1537_v44 }
0x1560   :  { %v1564_v0 = vpop.f32.mrf.mxu3 }
0x1561   :  { %v1565_v48 = vadd.f32 %v1660_v45, %v1564_v0 }
0x1563   :  { %1568 = vst.msk [vmem:[%s2253_s3] sm:$0xff] %vm1567_vm11, %v1565_v48 }
0x1564   :  { %1577 = vsyncpa [#allocation3], 1 }

</bundles_post_ra>
